<compile_context>
chip_gen: v5e
topology: v5e:2x2
jax: 0.10.0
libtpu: 0.0.40
codegen_flags: <defaults>
</compile_context>

<pallas_src>
import numpy as np
import jax
import jax.numpy as jnp
from jax import lax
from jax.experimental import pallas as pl
from jax.experimental.pallas import tpu as pltpu


def _rnn_kernel(beta_ref, init_ref, aux_ref, cij_ref, loss_ref):
    """Single invocation: runs the whole L-layer recurrence.

    beta_ref : SMEM (1,)        -- beta scalar
    init_ref : VMEM (4, N)      -- rows = log-clamped initial [S, E, I, R]
    aux_ref  : VMEM (L, 10, N)  -- precomputed per-layer weights (see glue)
    cij_ref  : VMEM (L, N, N)   -- contact matrices
    loss_ref : VMEM (1, 1)      -- scalar loss output
    """
    L = aux_ref.shape[0]
    beta = beta_ref[0]

    hS = init_ref[0:1, :]
    hE = init_ref[1:2, :]
    hI = init_ref[2:3, :]
    hR = init_ref[3:4, :]

    # Static (fully unrolled) loop over layers; L is small.
    for l in range(L):
        A = aux_ref[l]            # (10, N)
        T = cij_ref[l]            # (N, N)

        w_E   = A[0:1, :]         # -a*ts + logA0            (folded)
        w_EI  = A[1:2, :]         # log(clamp(c1*(e^-gt - e^-at)))
        w_II  = A[2:3, :]         # -gamma*ts
        w_ER  = A[3:4, :]         # log(clamp(1 + c2*e^-at - c1*e^-gt))
        w_IR  = A[4:5, :]         # log(clamp(1 - e^-gt))
        inv_s = A[5:6, :]         # 1 / clamp(sumT)
        bias  = A[6:7, :]         # log(beta) + log(clamp(sumT))*sumT/clamp(sumT) + logA0
        logA0 = A[7:8, :]
        logA1 = A[8:9, :]
        logA2 = A[9:10, :]

        # calc_Iit / calc_Rit (state-dependent part only)
        I2 = jnp.maximum(hE + w_EI, hI + w_II)
        R2 = jnp.maximum(jnp.maximum(hE + w_ER, hI + w_IR), hR)

        # ----- contact-matrix hot path (MXU) -----
        expI2 = jnp.exp(I2)                                       # (1, N)
        # mv[i] = sum_j T[i, j] * exp(I2[j])   (A @ B^T pattern, MXU-native)
        mv = lax.dot_general(expI2, T, (((1,), (1,)), ((), ())),
                             preferred_element_type=jnp.float32)  # (1, N)
        # I2T[i] = sum_j I2[j] * T[j, i]
        I2T = jnp.dot(I2, T, preferred_element_type=jnp.float32)  # (1, N)

        # calc_Sit / calc_newEit + per-layer observation weights Ail[l]
        new_S = hS - beta * mv + logA0
        new_E = jnp.maximum(hS + I2T * inv_s + bias, hE + w_E)
        new_I = I2 + logA1
        new_R = R2 + logA2
        hS, hE, hI, hR = new_S, new_E, new_I, new_R

    # loss = -mean_i max(hS, hE, hI, hR)
    final = jnp.maximum(jnp.maximum(hS, hE), jnp.maximum(hI, hR))
    loss_ref[...] = -jnp.mean(final, keepdims=True)


@jax.jit
def rnn_forward_pallas(a_raw, beta_raw, gamma_raw, param_ratio, eps,
                       init_Ail, Til, Ail, Cijl):
    """Glue: all state-independent per-layer precompute, then one pallas_call."""
    a     = jax.nn.sigmoid(a_raw) * param_ratio
    beta  = jax.nn.sigmoid(beta_raw) * param_ratio
    gamma = jax.nn.sigmoid(gamma_raw) * param_ratio
    clamp = lambda x: jnp.maximum(x, eps)                # my_clamp

    L, N = Til.shape
    c1 = a / (a - gamma)
    c2 = gamma / (a - gamma)

    ts = Til.astype(jnp.float32)                         # (L, N)
    exp_gts = jnp.exp(-gamma * ts)
    exp_ats = jnp.exp(-a * ts)

    logA = jnp.log(clamp(Ail.astype(jnp.float32)))       # (L, N, 3)
    logA0, logA1, logA2 = logA[:, :, 0], logA[:, :, 1], logA[:, :, 2]

    Cf = Cijl.astype(jnp.float32)                        # (L, N, N)
    sumT = jnp.sum(Cf, axis=1)                           # column sums, (L, N)
    inv_s = 1.0 / clamp(sumT)
    bias = jnp.log(beta) + jnp.log(clamp(sumT)) * sumT * inv_s + logA0

    w_E  = -a * ts + logA0
    w_EI = jnp.log(clamp(c1 * (exp_gts - exp_ats)))
    w_II = -gamma * ts
    w_ER = jnp.log(clamp(1.0 + c2 * exp_ats - c1 * exp_gts))
    w_IR = jnp.log(clamp(1.0 - exp_gts))

    aux = jnp.stack([w_E, w_EI, w_II, w_ER, w_IR,
                     inv_s, bias, logA0, logA1, logA2], axis=1)   # (L, 10, N)

    init_f = init_Ail.astype(jnp.float32)
    init_state = jnp.stack([
        jnp.log(clamp(init_f[:, 0])),
        jnp.full((N,), jnp.log(eps), jnp.float32),       # log(clamp(0)) = log(eps)
        jnp.log(clamp(init_f[:, 1])),
        jnp.log(clamp(init_f[:, 2])),
    ], axis=0)                                           # (4, N)

    beta_arr = jnp.reshape(beta.astype(jnp.float32), (1,))

    loss = pl.pallas_call(
        _rnn_kernel,
        out_shape=jax.ShapeDtypeStruct((1, 1), jnp.float32),
        in_specs=[
            pl.BlockSpec(memory_space=pltpu.MemorySpace.SMEM),   # beta scalar
            pl.BlockSpec(memory_space=pltpu.MemorySpace.VMEM),   # init_state (4, N)
            pl.BlockSpec(memory_space=pltpu.MemorySpace.VMEM),   # aux (L, 10, N)
            pl.BlockSpec(memory_space=pltpu.MemorySpace.VMEM),   # Cijl (L, N, N)
        ],
        out_specs=pl.BlockSpec(memory_space=pltpu.MemorySpace.VMEM),
    )(beta_arr, init_state, aux, Cf)
    return loss[0, 0]


def rnn_forward_ref(a_raw, beta_raw, gamma_raw, param_ratio, eps,
                    init_Ail, Til, Ail, Cijl):
    """Pure-JAX reference mirroring the PyTorch forward()."""
    a     = jax.nn.sigmoid(a_raw) * param_ratio
    beta  = jax.nn.sigmoid(beta_raw) * param_ratio
    gamma = jax.nn.sigmoid(gamma_raw) * param_ratio
    clamp = lambda x: jnp.maximum(x, eps)

    N = init_Ail.shape[0]
    hS = jnp.log(clamp(init_Ail[:, 0]))
    hE = jnp.log(clamp(jnp.zeros((N,), jnp.float32)))
    hI = jnp.log(clamp(init_Ail[:, 1]))
    hR = jnp.log(clamp(init_Ail[:, 2]))

    L = Til.shape[0]
    for l in range(L):
        ts, T = Til[l], Cijl[l]
        E2 = hE - a * ts
        I2 = jnp.maximum(
            hE + jnp.log(clamp(a / (a - gamma) *
                               (jnp.exp(-gamma * ts) - jnp.exp(-a * ts)))),
            hI - gamma * ts)
        R2 = jnp.maximum(
            jnp.maximum(
                hE + jnp.log(clamp(1.0 + gamma / (a - gamma) * jnp.exp(-a * ts)
                                   - a / (a - gamma) * jnp.exp(-gamma * ts))),
                hI + jnp.log(clamp(1.0 - jnp.exp(-gamma * ts)))),
            hR)
        mv = T @ jnp.exp(I2)
        S3 = hS - beta * mv
        sumT = jnp.sum(T, axis=0)
        Sw = jnp.log(beta) + (I2 @ T + jnp.log(clamp(sumT)) * sumT) / clamp(sumT)
        E3 = jnp.maximum(hS + Sw, E2)
        hS = S3 + jnp.log(clamp(Ail[l, :, 0]))
        hE = E3 + jnp.log(clamp(Ail[l, :, 0]))
        hI = I2 + jnp.log(clamp(Ail[l, :, 1]))
        hR = R2 + jnp.log(clamp(Ail[l, :, 2]))
    return -jnp.mean(jnp.maximum(jnp.maximum(hS, hE), jnp.maximum(hI, hR)))


if __name__ == "__main__":
    num_nodes  = 128
    num_layers = 8
    eps        = 1e-6
    param_ratio = 1.0
    a_init, beta_init, gamma_init = 0.3, -0.2, -0.8

    key = jax.random.PRNGKey(0)
    k1, k2, k3, k4 = jax.random.split(key, 4)
    Cijl = jax.random.uniform(k1, (num_layers, num_nodes, num_nodes),
                              jnp.float32, 0.0, 0.2)
    Til  = jax.random.uniform(k2, (num_layers, num_nodes), jnp.float32, 0.1, 1.0)
    Ail  = jax.random.uniform(k3, (num_layers, num_nodes, 3), jnp.float32, 0.1, 1.0)
    init_raw = jax.random.uniform(k4, (num_nodes, 3), jnp.float32, 0.01, 1.0)
    init_Ail = init_raw / jnp.sum(init_raw, axis=1, keepdims=True)

    args = (jnp.float32(a_init), jnp.float32(beta_init), jnp.float32(gamma_init),
            jnp.float32(param_ratio), jnp.float32(eps),
            init_Ail, Til, Ail, Cijl)

    loss = jax.block_until_ready(rnn_forward_pallas(*args))
    ref  = jax.block_until_ready(rnn_forward_ref(*args))

    np.testing.assert_allclose(np.asarray(loss), np.asarray(ref),
                               rtol=1e-2, atol=1e-2)
    print("KERNEL_OK")
</pallas_src>

<mosaic_0001>
module attributes {stable_mosaic.version = 11 : i64} {
  func.func @_rnn_kernel(%arg0: memref<1xf32, #tpu.memory_space<smem>>, %arg1: memref<4x128xf32, #tpu.memory_space<vmem>>, %arg2: memref<8x10x128xf32, #tpu.memory_space<vmem>>, %arg3: memref<8x128x128xf32, #tpu.memory_space<vmem>>, %arg4: memref<1x1xf32, #tpu.memory_space<vmem>>) attributes {dimension_semantics = [], scalar_prefetch = 0 : i64, scratch_operands = 0 : i64, tpu.core_type = #tpu.core_type<tc>} {
    %c0 = arith.constant 0 : index
    %0 = memref.load %arg0[%c0] : memref<1xf32, #tpu.memory_space<smem>>
    %c0_0 = arith.constant 0 : index
    %c0_1 = arith.constant 0 : index
    %1 = vector.load %arg1[%c0_0, %c0_1] : memref<4x128xf32, #tpu.memory_space<vmem>>, vector<1x128xf32>
    %c1 = arith.constant 1 : index
    %c0_2 = arith.constant 0 : index
    %2 = vector.load %arg1[%c1, %c0_2] : memref<4x128xf32, #tpu.memory_space<vmem>>, vector<1x128xf32>
    %c2 = arith.constant 2 : index
    %c0_3 = arith.constant 0 : index
    %3 = vector.load %arg1[%c2, %c0_3] : memref<4x128xf32, #tpu.memory_space<vmem>>, vector<1x128xf32>
    %c3 = arith.constant 3 : index
    %c0_4 = arith.constant 0 : index
    %4 = vector.load %arg1[%c3, %c0_4] : memref<4x128xf32, #tpu.memory_space<vmem>>, vector<1x128xf32>
    %c0_5 = arith.constant 0 : index
    %c0_6 = arith.constant 0 : index
    %c0_7 = arith.constant 0 : index
    %5 = vector.load %arg2[%c0_5, %c0_6, %c0_7] : memref<8x10x128xf32, #tpu.memory_space<vmem>>, vector<1x10x128xf32>
    %6 = vector.shape_cast %5 : vector<1x10x128xf32> to vector<10x128xf32>
    %c0_8 = arith.constant 0 : index
    %c0_9 = arith.constant 0 : index
    %c0_10 = arith.constant 0 : index
    %7 = vector.load %arg3[%c0_8, %c0_9, %c0_10] : memref<8x128x128xf32, #tpu.memory_space<vmem>>, vector<1x128x128xf32>
    %8 = vector.shape_cast %7 : vector<1x128x128xf32> to vector<128x128xf32>
    %9 = vector.extract_strided_slice %6 {offsets = [0, 0], sizes = [1, 128], strides = [1, 1]} : vector<10x128xf32> to vector<1x128xf32>
    %10 = vector.extract_strided_slice %6 {offsets = [1, 0], sizes = [1, 128], strides = [1, 1]} : vector<10x128xf32> to vector<1x128xf32>
    %11 = vector.extract_strided_slice %6 {offsets = [2, 0], sizes = [1, 128], strides = [1, 1]} : vector<10x128xf32> to vector<1x128xf32>
    %12 = vector.extract_strided_slice %6 {offsets = [3, 0], sizes = [1, 128], strides = [1, 1]} : vector<10x128xf32> to vector<1x128xf32>
    %13 = vector.extract_strided_slice %6 {offsets = [4, 0], sizes = [1, 128], strides = [1, 1]} : vector<10x128xf32> to vector<1x128xf32>
    %14 = vector.extract_strided_slice %6 {offsets = [5, 0], sizes = [1, 128], strides = [1, 1]} : vector<10x128xf32> to vector<1x128xf32>
    %15 = vector.extract_strided_slice %6 {offsets = [6, 0], sizes = [1, 128], strides = [1, 1]} : vector<10x128xf32> to vector<1x128xf32>
    %16 = vector.extract_strided_slice %6 {offsets = [7, 0], sizes = [1, 128], strides = [1, 1]} : vector<10x128xf32> to vector<1x128xf32>
    %17 = vector.extract_strided_slice %6 {offsets = [8, 0], sizes = [1, 128], strides = [1, 1]} : vector<10x128xf32> to vector<1x128xf32>
    %18 = vector.extract_strided_slice %6 {offsets = [9, 0], sizes = [1, 128], strides = [1, 1]} : vector<10x128xf32> to vector<1x128xf32>
    %19 = arith.addf %2, %10 : vector<1x128xf32>
    %20 = arith.addf %3, %11 : vector<1x128xf32>
    %21 = arith.maximumf %19, %20 : vector<1x128xf32>
    %22 = arith.addf %2, %12 : vector<1x128xf32>
    %23 = arith.addf %3, %13 : vector<1x128xf32>
    %24 = arith.maximumf %22, %23 : vector<1x128xf32>
    %25 = arith.maximumf %24, %4 : vector<1x128xf32>
    %26 = math.exp %21 : vector<1x128xf32>
    %cst = arith.constant dense<0.000000e+00> : vector<1x128xf32>
    %27 = tpu.matmul %26, %8, %cst {dimension_numbers = #tpu.dot_dimension_numbers<[1], [1], [0], [0], [0, 0, 1, 0], [], []>} : vector<1x128xf32>, vector<128x128xf32>, vector<1x128xf32> -> vector<1x128xf32>
    %cst_11 = arith.constant dense<0.000000e+00> : vector<1x128xf32>
    %28 = tpu.matmul %21, %8, %cst_11 {dimension_numbers = #tpu.dot_dimension_numbers<[1], [0], [0], [1], [0, 0, 1, 1], [], []>} : vector<1x128xf32>, vector<128x128xf32>, vector<1x128xf32> -> vector<1x128xf32>
    %29 = vector.broadcast %0 : f32 to vector<1x128xf32>
    %30 = arith.mulf %29, %27 : vector<1x128xf32>
    %31 = arith.subf %1, %30 : vector<1x128xf32>
    %32 = arith.addf %31, %16 : vector<1x128xf32>
    %33 = arith.mulf %28, %14 : vector<1x128xf32>
    %34 = arith.addf %1, %33 : vector<1x128xf32>
    %35 = arith.addf %34, %15 : vector<1x128xf32>
    %36 = arith.addf %2, %9 : vector<1x128xf32>
    %37 = arith.maximumf %35, %36 : vector<1x128xf32>
    %38 = arith.addf %21, %17 : vector<1x128xf32>
    %39 = arith.addf %25, %18 : vector<1x128xf32>
    %c1_12 = arith.constant 1 : index
    %c0_13 = arith.constant 0 : index
    %c0_14 = arith.constant 0 : index
    %40 = vector.load %arg2[%c1_12, %c0_13, %c0_14] : memref<8x10x128xf32, #tpu.memory_space<vmem>>, vector<1x10x128xf32>
    %41 = vector.shape_cast %40 : vector<1x10x128xf32> to vector<10x128xf32>
    %c1_15 = arith.constant 1 : index
    %c0_16 = arith.constant 0 : index
    %c0_17 = arith.constant 0 : index
    %42 = vector.load %arg3[%c1_15, %c0_16, %c0_17] : memref<8x128x128xf32, #tpu.memory_space<vmem>>, vector<1x128x128xf32>
    %43 = vector.shape_cast %42 : vector<1x128x128xf32> to vector<128x128xf32>
    %44 = vector.extract_strided_slice %41 {offsets = [0, 0], sizes = [1, 128], strides = [1, 1]} : vector<10x128xf32> to vector<1x128xf32>
    %45 = vector.extract_strided_slice %41 {offsets = [1, 0], sizes = [1, 128], strides = [1, 1]} : vector<10x128xf32> to vector<1x128xf32>
    %46 = vector.extract_strided_slice %41 {offsets = [2, 0], sizes = [1, 128], strides = [1, 1]} : vector<10x128xf32> to vector<1x128xf32>
    %47 = vector.extract_strided_slice %41 {offsets = [3, 0], sizes = [1, 128], strides = [1, 1]} : vector<10x128xf32> to vector<1x128xf32>
    %48 = vector.extract_strided_slice %41 {offsets = [4, 0], sizes = [1, 128], strides = [1, 1]} : vector<10x128xf32> to vector<1x128xf32>
    %49 = vector.extract_strided_slice %41 {offsets = [5, 0], sizes = [1, 128], strides = [1, 1]} : vector<10x128xf32> to vector<1x128xf32>
    %50 = vector.extract_strided_slice %41 {offsets = [6, 0], sizes = [1, 128], strides = [1, 1]} : vector<10x128xf32> to vector<1x128xf32>
    %51 = vector.extract_strided_slice %41 {offsets = [7, 0], sizes = [1, 128], strides = [1, 1]} : vector<10x128xf32> to vector<1x128xf32>
    %52 = vector.extract_strided_slice %41 {offsets = [8, 0], sizes = [1, 128], strides = [1, 1]} : vector<10x128xf32> to vector<1x128xf32>
    %53 = vector.extract_strided_slice %41 {offsets = [9, 0], sizes = [1, 128], strides = [1, 1]} : vector<10x128xf32> to vector<1x128xf32>
    %54 = arith.addf %37, %45 : vector<1x128xf32>
    %55 = arith.addf %38, %46 : vector<1x128xf32>
    %56 = arith.maximumf %54, %55 : vector<1x128xf32>
    %57 = arith.addf %37, %47 : vector<1x128xf32>
    %58 = arith.addf %38, %48 : vector<1x128xf32>
    %59 = arith.maximumf %57, %58 : vector<1x128xf32>
    %60 = arith.maximumf %59, %39 : vector<1x128xf32>
    %61 = math.exp %56 : vector<1x128xf32>
    %cst_18 = arith.constant dense<0.000000e+00> : vector<1x128xf32>
    %62 = tpu.matmul %61, %43, %cst_18 {dimension_numbers = #tpu.dot_dimension_numbers<[1], [1], [0], [0], [0, 0, 1, 0], [], []>} : vector<1x128xf32>, vector<128x128xf32>, vector<1x128xf32> -> vector<1x128xf32>
    %cst_19 = arith.constant dense<0.000000e+00> : vector<1x128xf32>
    %63 = tpu.matmul %56, %43, %cst_19 {dimension_numbers = #tpu.dot_dimension_numbers<[1], [0], [0], [1], [0, 0, 1, 1], [], []>} : vector<1x128xf32>, vector<128x128xf32>, vector<1x128xf32> -> vector<1x128xf32>
    %64 = vector.broadcast %0 : f32 to vector<1x128xf32>
    %65 = arith.mulf %64, %62 : vector<1x128xf32>
    %66 = arith.subf %32, %65 : vector<1x128xf32>
    %67 = arith.addf %66, %51 : vector<1x128xf32>
    %68 = arith.mulf %63, %49 : vector<1x128xf32>
    %69 = arith.addf %32, %68 : vector<1x128xf32>
    %70 = arith.addf %69, %50 : vector<1x128xf32>
    %71 = arith.addf %37, %44 : vector<1x128xf32>
    %72 = arith.maximumf %70, %71 : vector<1x128xf32>
    %73 = arith.addf %56, %52 : vector<1x128xf32>
    %74 = arith.addf %60, %53 : vector<1x128xf32>
    %c2_20 = arith.constant 2 : index
    %c0_21 = arith.constant 0 : index
    %c0_22 = arith.constant 0 : index
    %75 = vector.load %arg2[%c2_20, %c0_21, %c0_22] : memref<8x10x128xf32, #tpu.memory_space<vmem>>, vector<1x10x128xf32>
    %76 = vector.shape_cast %75 : vector<1x10x128xf32> to vector<10x128xf32>
    %c2_23 = arith.constant 2 : index
    %c0_24 = arith.constant 0 : index
    %c0_25 = arith.constant 0 : index
    %77 = vector.load %arg3[%c2_23, %c0_24, %c0_25] : memref<8x128x128xf32, #tpu.memory_space<vmem>>, vector<1x128x128xf32>
    %78 = vector.shape_cast %77 : vector<1x128x128xf32> to vector<128x128xf32>
    %79 = vector.extract_strided_slice %76 {offsets = [0, 0], sizes = [1, 128], strides = [1, 1]} : vector<10x128xf32> to vector<1x128xf32>
    %80 = vector.extract_strided_slice %76 {offsets = [1, 0], sizes = [1, 128], strides = [1, 1]} : vector<10x128xf32> to vector<1x128xf32>
    %81 = vector.extract_strided_slice %76 {offsets = [2, 0], sizes = [1, 128], strides = [1, 1]} : vector<10x128xf32> to vector<1x128xf32>
    %82 = vector.extract_strided_slice %76 {offsets = [3, 0], sizes = [1, 128], strides = [1, 1]} : vector<10x128xf32> to vector<1x128xf32>
    %83 = vector.extract_strided_slice %76 {offsets = [4, 0], sizes = [1, 128], strides = [1, 1]} : vector<10x128xf32> to vector<1x128xf32>
    %84 = vector.extract_strided_slice %76 {offsets = [5, 0], sizes = [1, 128], strides = [1, 1]} : vector<10x128xf32> to vector<1x128xf32>
    %85 = vector.extract_strided_slice %76 {offsets = [6, 0], sizes = [1, 128], strides = [1, 1]} : vector<10x128xf32> to vector<1x128xf32>
    %86 = vector.extract_strided_slice %76 {offsets = [7, 0], sizes = [1, 128], strides = [1, 1]} : vector<10x128xf32> to vector<1x128xf32>
    %87 = vector.extract_strided_slice %76 {offsets = [8, 0], sizes = [1, 128], strides = [1, 1]} : vector<10x128xf32> to vector<1x128xf32>
    %88 = vector.extract_strided_slice %76 {offsets = [9, 0], sizes = [1, 128], strides = [1, 1]} : vector<10x128xf32> to vector<1x128xf32>
    %89 = arith.addf %72, %80 : vector<1x128xf32>
    %90 = arith.addf %73, %81 : vector<1x128xf32>
    %91 = arith.maximumf %89, %90 : vector<1x128xf32>
    %92 = arith.addf %72, %82 : vector<1x128xf32>
    %93 = arith.addf %73, %83 : vector<1x128xf32>
    %94 = arith.maximumf %92, %93 : vector<1x128xf32>
    %95 = arith.maximumf %94, %74 : vector<1x128xf32>
    %96 = math.exp %91 : vector<1x128xf32>
    %cst_26 = arith.constant dense<0.000000e+00> : vector<1x128xf32>
    %97 = tpu.matmul %96, %78, %cst_26 {dimension_numbers = #tpu.dot_dimension_numbers<[1], [1], [0], [0], [0, 0, 1, 0], [], []>} : vector<1x128xf32>, vector<128x128xf32>, vector<1x128xf32> -> vector<1x128xf32>
    %cst_27 = arith.constant dense<0.000000e+00> : vector<1x128xf32>
    %98 = tpu.matmul %91, %78, %cst_27 {dimension_numbers = #tpu.dot_dimension_numbers<[1], [0], [0], [1], [0, 0, 1, 1], [], []>} : vector<1x128xf32>, vector<128x128xf32>, vector<1x128xf32> -> vector<1x128xf32>
    %99 = vector.broadcast %0 : f32 to vector<1x128xf32>
    %100 = arith.mulf %99, %97 : vector<1x128xf32>
    %101 = arith.subf %67, %100 : vector<1x128xf32>
    %102 = arith.addf %101, %86 : vector<1x128xf32>
    %103 = arith.mulf %98, %84 : vector<1x128xf32>
    %104 = arith.addf %67, %103 : vector<1x128xf32>
    %105 = arith.addf %104, %85 : vector<1x128xf32>
    %106 = arith.addf %72, %79 : vector<1x128xf32>
    %107 = arith.maximumf %105, %106 : vector<1x128xf32>
    %108 = arith.addf %91, %87 : vector<1x128xf32>
    %109 = arith.addf %95, %88 : vector<1x128xf32>
    %c3_28 = arith.constant 3 : index
    %c0_29 = arith.constant 0 : index
    %c0_30 = arith.constant 0 : index
    %110 = vector.load %arg2[%c3_28, %c0_29, %c0_30] : memref<8x10x128xf32, #tpu.memory_space<vmem>>, vector<1x10x128xf32>
    %111 = vector.shape_cast %110 : vector<1x10x128xf32> to vector<10x128xf32>
    %c3_31 = arith.constant 3 : index
    %c0_32 = arith.constant 0 : index
    %c0_33 = arith.constant 0 : index
    %112 = vector.load %arg3[%c3_31, %c0_32, %c0_33] : memref<8x128x128xf32, #tpu.memory_space<vmem>>, vector<1x128x128xf32>
    %113 = vector.shape_cast %112 : vector<1x128x128xf32> to vector<128x128xf32>
    %114 = vector.extract_strided_slice %111 {offsets = [0, 0], sizes = [1, 128], strides = [1, 1]} : vector<10x128xf32> to vector<1x128xf32>
    %115 = vector.extract_strided_slice %111 {offsets = [1, 0], sizes = [1, 128], strides = [1, 1]} : vector<10x128xf32> to vector<1x128xf32>
    %116 = vector.extract_strided_slice %111 {offsets = [2, 0], sizes = [1, 128], strides = [1, 1]} : vector<10x128xf32> to vector<1x128xf32>
    %117 = vector.extract_strided_slice %111 {offsets = [3, 0], sizes = [1, 128], strides = [1, 1]} : vector<10x128xf32> to vector<1x128xf32>
    %118 = vector.extract_strided_slice %111 {offsets = [4, 0], sizes = [1, 128], strides = [1, 1]} : vector<10x128xf32> to vector<1x128xf32>
    %119 = vector.extract_strided_slice %111 {offsets = [5, 0], sizes = [1, 128], strides = [1, 1]} : vector<10x128xf32> to vector<1x128xf32>
    %120 = vector.extract_strided_slice %111 {offsets = [6, 0], sizes = [1, 128], strides = [1, 1]} : vector<10x128xf32> to vector<1x128xf32>
    %121 = vector.extract_strided_slice %111 {offsets = [7, 0], sizes = [1, 128], strides = [1, 1]} : vector<10x128xf32> to vector<1x128xf32>
    %122 = vector.extract_strided_slice %111 {offsets = [8, 0], sizes = [1, 128], strides = [1, 1]} : vector<10x128xf32> to vector<1x128xf32>
    %123 = vector.extract_strided_slice %111 {offsets = [9, 0], sizes = [1, 128], strides = [1, 1]} : vector<10x128xf32> to vector<1x128xf32>
    %124 = arith.addf %107, %115 : vector<1x128xf32>
    %125 = arith.addf %108, %116 : vector<1x128xf32>
    %126 = arith.maximumf %124, %125 : vector<1x128xf32>
    %127 = arith.addf %107, %117 : vector<1x128xf32>
    %128 = arith.addf %108, %118 : vector<1x128xf32>
    %129 = arith.maximumf %127, %128 : vector<1x128xf32>
    %130 = arith.maximumf %129, %109 : vector<1x128xf32>
    %131 = math.exp %126 : vector<1x128xf32>
    %cst_34 = arith.constant dense<0.000000e+00> : vector<1x128xf32>
    %132 = tpu.matmul %131, %113, %cst_34 {dimension_numbers = #tpu.dot_dimension_numbers<[1], [1], [0], [0], [0, 0, 1, 0], [], []>} : vector<1x128xf32>, vector<128x128xf32>, vector<1x128xf32> -> vector<1x128xf32>
    %cst_35 = arith.constant dense<0.000000e+00> : vector<1x128xf32>
    %133 = tpu.matmul %126, %113, %cst_35 {dimension_numbers = #tpu.dot_dimension_numbers<[1], [0], [0], [1], [0, 0, 1, 1], [], []>} : vector<1x128xf32>, vector<128x128xf32>, vector<1x128xf32> -> vector<1x128xf32>
    %134 = vector.broadcast %0 : f32 to vector<1x128xf32>
    %135 = arith.mulf %134, %132 : vector<1x128xf32>
    %136 = arith.subf %102, %135 : vector<1x128xf32>
    %137 = arith.addf %136, %121 : vector<1x128xf32>
    %138 = arith.mulf %133, %119 : vector<1x128xf32>
    %139 = arith.addf %102, %138 : vector<1x128xf32>
    %140 = arith.addf %139, %120 : vector<1x128xf32>
    %141 = arith.addf %107, %114 : vector<1x128xf32>
    %142 = arith.maximumf %140, %141 : vector<1x128xf32>
    %143 = arith.addf %126, %122 : vector<1x128xf32>
    %144 = arith.addf %130, %123 : vector<1x128xf32>
    %c4 = arith.constant 4 : index
    %c0_36 = arith.constant 0 : index
    %c0_37 = arith.constant 0 : index
    %145 = vector.load %arg2[%c4, %c0_36, %c0_37] : memref<8x10x128xf32, #tpu.memory_space<vmem>>, vector<1x10x128xf32>
    %146 = vector.shape_cast %145 : vector<1x10x128xf32> to vector<10x128xf32>
    %c4_38 = arith.constant 4 : index
    %c0_39 = arith.constant 0 : index
    %c0_40 = arith.constant 0 : index
    %147 = vector.load %arg3[%c4_38, %c0_39, %c0_40] : memref<8x128x128xf32, #tpu.memory_space<vmem>>, vector<1x128x128xf32>
    %148 = vector.shape_cast %147 : vector<1x128x128xf32> to vector<128x128xf32>
    %149 = vector.extract_strided_slice %146 {offsets = [0, 0], sizes = [1, 128], strides = [1, 1]} : vector<10x128xf32> to vector<1x128xf32>
    %150 = vector.extract_strided_slice %146 {offsets = [1, 0], sizes = [1, 128], strides = [1, 1]} : vector<10x128xf32> to vector<1x128xf32>
    %151 = vector.extract_strided_slice %146 {offsets = [2, 0], sizes = [1, 128], strides = [1, 1]} : vector<10x128xf32> to vector<1x128xf32>
    %152 = vector.extract_strided_slice %146 {offsets = [3, 0], sizes = [1, 128], strides = [1, 1]} : vector<10x128xf32> to vector<1x128xf32>
    %153 = vector.extract_strided_slice %146 {offsets = [4, 0], sizes = [1, 128], strides = [1, 1]} : vector<10x128xf32> to vector<1x128xf32>
    %154 = vector.extract_strided_slice %146 {offsets = [5, 0], sizes = [1, 128], strides = [1, 1]} : vector<10x128xf32> to vector<1x128xf32>
    %155 = vector.extract_strided_slice %146 {offsets = [6, 0], sizes = [1, 128], strides = [1, 1]} : vector<10x128xf32> to vector<1x128xf32>
    %156 = vector.extract_strided_slice %146 {offsets = [7, 0], sizes = [1, 128], strides = [1, 1]} : vector<10x128xf32> to vector<1x128xf32>
    %157 = vector.extract_strided_slice %146 {offsets = [8, 0], sizes = [1, 128], strides = [1, 1]} : vector<10x128xf32> to vector<1x128xf32>
    %158 = vector.extract_strided_slice %146 {offsets = [9, 0], sizes = [1, 128], strides = [1, 1]} : vector<10x128xf32> to vector<1x128xf32>
    %159 = arith.addf %142, %150 : vector<1x128xf32>
    %160 = arith.addf %143, %151 : vector<1x128xf32>
    %161 = arith.maximumf %159, %160 : vector<1x128xf32>
    %162 = arith.addf %142, %152 : vector<1x128xf32>
    %163 = arith.addf %143, %153 : vector<1x128xf32>
    %164 = arith.maximumf %162, %163 : vector<1x128xf32>
    %165 = arith.maximumf %164, %144 : vector<1x128xf32>
    %166 = math.exp %161 : vector<1x128xf32>
    %cst_41 = arith.constant dense<0.000000e+00> : vector<1x128xf32>
    %167 = tpu.matmul %166, %148, %cst_41 {dimension_numbers = #tpu.dot_dimension_numbers<[1], [1], [0], [0], [0, 0, 1, 0], [], []>} : vector<1x128xf32>, vector<128x128xf32>, vector<1x128xf32> -> vector<1x128xf32>
    %cst_42 = arith.constant dense<0.000000e+00> : vector<1x128xf32>
    %168 = tpu.matmul %161, %148, %cst_42 {dimension_numbers = #tpu.dot_dimension_numbers<[1], [0], [0], [1], [0, 0, 1, 1], [], []>} : vector<1x128xf32>, vector<128x128xf32>, vector<1x128xf32> -> vector<1x128xf32>
    %169 = vector.broadcast %0 : f32 to vector<1x128xf32>
    %170 = arith.mulf %169, %167 : vector<1x128xf32>
    %171 = arith.subf %137, %170 : vector<1x128xf32>
    %172 = arith.addf %171, %156 : vector<1x128xf32>
    %173 = arith.mulf %168, %154 : vector<1x128xf32>
    %174 = arith.addf %137, %173 : vector<1x128xf32>
    %175 = arith.addf %174, %155 : vector<1x128xf32>
    %176 = arith.addf %142, %149 : vector<1x128xf32>
    %177 = arith.maximumf %175, %176 : vector<1x128xf32>
    %178 = arith.addf %161, %157 : vector<1x128xf32>
    %179 = arith.addf %165, %158 : vector<1x128xf32>
    %c5 = arith.constant 5 : index
    %c0_43 = arith.constant 0 : index
    %c0_44 = arith.constant 0 : index
    %180 = vector.load %arg2[%c5, %c0_43, %c0_44] : memref<8x10x128xf32, #tpu.memory_space<vmem>>, vector<1x10x128xf32>
    %181 = vector.shape_cast %180 : vector<1x10x128xf32> to vector<10x128xf32>
    %c5_45 = arith.constant 5 : index
    %c0_46 = arith.constant 0 : index
    %c0_47 = arith.constant 0 : index
    %182 = vector.load %arg3[%c5_45, %c0_46, %c0_47] : memref<8x128x128xf32, #tpu.memory_space<vmem>>, vector<1x128x128xf32>
    %183 = vector.shape_cast %182 : vector<1x128x128xf32> to vector<128x128xf32>
    %184 = vector.extract_strided_slice %181 {offsets = [0, 0], sizes = [1, 128], strides = [1, 1]} : vector<10x128xf32> to vector<1x128xf32>
    %185 = vector.extract_strided_slice %181 {offsets = [1, 0], sizes = [1, 128], strides = [1, 1]} : vector<10x128xf32> to vector<1x128xf32>
    %186 = vector.extract_strided_slice %181 {offsets = [2, 0], sizes = [1, 128], strides = [1, 1]} : vector<10x128xf32> to vector<1x128xf32>
    %187 = vector.extract_strided_slice %181 {offsets = [3, 0], sizes = [1, 128], strides = [1, 1]} : vector<10x128xf32> to vector<1x128xf32>
    %188 = vector.extract_strided_slice %181 {offsets = [4, 0], sizes = [1, 128], strides = [1, 1]} : vector<10x128xf32> to vector<1x128xf32>
    %189 = vector.extract_strided_slice %181 {offsets = [5, 0], sizes = [1, 128], strides = [1, 1]} : vector<10x128xf32> to vector<1x128xf32>
    %190 = vector.extract_strided_slice %181 {offsets = [6, 0], sizes = [1, 128], strides = [1, 1]} : vector<10x128xf32> to vector<1x128xf32>
    %191 = vector.extract_strided_slice %181 {offsets = [7, 0], sizes = [1, 128], strides = [1, 1]} : vector<10x128xf32> to vector<1x128xf32>
    %192 = vector.extract_strided_slice %181 {offsets = [8, 0], sizes = [1, 128], strides = [1, 1]} : vector<10x128xf32> to vector<1x128xf32>
    %193 = vector.extract_strided_slice %181 {offsets = [9, 0], sizes = [1, 128], strides = [1, 1]} : vector<10x128xf32> to vector<1x128xf32>
    %194 = arith.addf %177, %185 : vector<1x128xf32>
    %195 = arith.addf %178, %186 : vector<1x128xf32>
    %196 = arith.maximumf %194, %195 : vector<1x128xf32>
    %197 = arith.addf %177, %187 : vector<1x128xf32>
    %198 = arith.addf %178, %188 : vector<1x128xf32>
    %199 = arith.maximumf %197, %198 : vector<1x128xf32>
    %200 = arith.maximumf %199, %179 : vector<1x128xf32>
    %201 = math.exp %196 : vector<1x128xf32>
    %cst_48 = arith.constant dense<0.000000e+00> : vector<1x128xf32>
    %202 = tpu.matmul %201, %183, %cst_48 {dimension_numbers = #tpu.dot_dimension_numbers<[1], [1], [0], [0], [0, 0, 1, 0], [], []>} : vector<1x128xf32>, vector<128x128xf32>, vector<1x128xf32> -> vector<1x128xf32>
    %cst_49 = arith.constant dense<0.000000e+00> : vector<1x128xf32>
    %203 = tpu.matmul %196, %183, %cst_49 {dimension_numbers = #tpu.dot_dimension_numbers<[1], [0], [0], [1], [0, 0, 1, 1], [], []>} : vector<1x128xf32>, vector<128x128xf32>, vector<1x128xf32> -> vector<1x128xf32>
    %204 = vector.broadcast %0 : f32 to vector<1x128xf32>
    %205 = arith.mulf %204, %202 : vector<1x128xf32>
    %206 = arith.subf %172, %205 : vector<1x128xf32>
    %207 = arith.addf %206, %191 : vector<1x128xf32>
    %208 = arith.mulf %203, %189 : vector<1x128xf32>
    %209 = arith.addf %172, %208 : vector<1x128xf32>
    %210 = arith.addf %209, %190 : vector<1x128xf32>
    %211 = arith.addf %177, %184 : vector<1x128xf32>
    %212 = arith.maximumf %210, %211 : vector<1x128xf32>
    %213 = arith.addf %196, %192 : vector<1x128xf32>
    %214 = arith.addf %200, %193 : vector<1x128xf32>
    %c6 = arith.constant 6 : index
    %c0_50 = arith.constant 0 : index
    %c0_51 = arith.constant 0 : index
    %215 = vector.load %arg2[%c6, %c0_50, %c0_51] : memref<8x10x128xf32, #tpu.memory_space<vmem>>, vector<1x10x128xf32>
    %216 = vector.shape_cast %215 : vector<1x10x128xf32> to vector<10x128xf32>
    %c6_52 = arith.constant 6 : index
    %c0_53 = arith.constant 0 : index
    %c0_54 = arith.constant 0 : index
    %217 = vector.load %arg3[%c6_52, %c0_53, %c0_54] : memref<8x128x128xf32, #tpu.memory_space<vmem>>, vector<1x128x128xf32>
    %218 = vector.shape_cast %217 : vector<1x128x128xf32> to vector<128x128xf32>
    %219 = vector.extract_strided_slice %216 {offsets = [0, 0], sizes = [1, 128], strides = [1, 1]} : vector<10x128xf32> to vector<1x128xf32>
    %220 = vector.extract_strided_slice %216 {offsets = [1, 0], sizes = [1, 128], strides = [1, 1]} : vector<10x128xf32> to vector<1x128xf32>
    %221 = vector.extract_strided_slice %216 {offsets = [2, 0], sizes = [1, 128], strides = [1, 1]} : vector<10x128xf32> to vector<1x128xf32>
    %222 = vector.extract_strided_slice %216 {offsets = [3, 0], sizes = [1, 128], strides = [1, 1]} : vector<10x128xf32> to vector<1x128xf32>
    %223 = vector.extract_strided_slice %216 {offsets = [4, 0], sizes = [1, 128], strides = [1, 1]} : vector<10x128xf32> to vector<1x128xf32>
    %224 = vector.extract_strided_slice %216 {offsets = [5, 0], sizes = [1, 128], strides = [1, 1]} : vector<10x128xf32> to vector<1x128xf32>
    %225 = vector.extract_strided_slice %216 {offsets = [6, 0], sizes = [1, 128], strides = [1, 1]} : vector<10x128xf32> to vector<1x128xf32>
    %226 = vector.extract_strided_slice %216 {offsets = [7, 0], sizes = [1, 128], strides = [1, 1]} : vector<10x128xf32> to vector<1x128xf32>
    %227 = vector.extract_strided_slice %216 {offsets = [8, 0], sizes = [1, 128], strides = [1, 1]} : vector<10x128xf32> to vector<1x128xf32>
    %228 = vector.extract_strided_slice %216 {offsets = [9, 0], sizes = [1, 128], strides = [1, 1]} : vector<10x128xf32> to vector<1x128xf32>
    %229 = arith.addf %212, %220 : vector<1x128xf32>
    %230 = arith.addf %213, %221 : vector<1x128xf32>
    %231 = arith.maximumf %229, %230 : vector<1x128xf32>
    %232 = arith.addf %212, %222 : vector<1x128xf32>
    %233 = arith.addf %213, %223 : vector<1x128xf32>
    %234 = arith.maximumf %232, %233 : vector<1x128xf32>
    %235 = arith.maximumf %234, %214 : vector<1x128xf32>
    %236 = math.exp %231 : vector<1x128xf32>
    %cst_55 = arith.constant dense<0.000000e+00> : vector<1x128xf32>
    %237 = tpu.matmul %236, %218, %cst_55 {dimension_numbers = #tpu.dot_dimension_numbers<[1], [1], [0], [0], [0, 0, 1, 0], [], []>} : vector<1x128xf32>, vector<128x128xf32>, vector<1x128xf32> -> vector<1x128xf32>
    %cst_56 = arith.constant dense<0.000000e+00> : vector<1x128xf32>
    %238 = tpu.matmul %231, %218, %cst_56 {dimension_numbers = #tpu.dot_dimension_numbers<[1], [0], [0], [1], [0, 0, 1, 1], [], []>} : vector<1x128xf32>, vector<128x128xf32>, vector<1x128xf32> -> vector<1x128xf32>
    %239 = vector.broadcast %0 : f32 to vector<1x128xf32>
    %240 = arith.mulf %239, %237 : vector<1x128xf32>
    %241 = arith.subf %207, %240 : vector<1x128xf32>
    %242 = arith.addf %241, %226 : vector<1x128xf32>
    %243 = arith.mulf %238, %224 : vector<1x128xf32>
    %244 = arith.addf %207, %243 : vector<1x128xf32>
    %245 = arith.addf %244, %225 : vector<1x128xf32>
    %246 = arith.addf %212, %219 : vector<1x128xf32>
    %247 = arith.maximumf %245, %246 : vector<1x128xf32>
    %248 = arith.addf %231, %227 : vector<1x128xf32>
    %249 = arith.addf %235, %228 : vector<1x128xf32>
    %c7 = arith.constant 7 : index
    %c0_57 = arith.constant 0 : index
    %c0_58 = arith.constant 0 : index
    %250 = vector.load %arg2[%c7, %c0_57, %c0_58] : memref<8x10x128xf32, #tpu.memory_space<vmem>>, vector<1x10x128xf32>
    %251 = vector.shape_cast %250 : vector<1x10x128xf32> to vector<10x128xf32>
    %c7_59 = arith.constant 7 : index
    %c0_60 = arith.constant 0 : index
    %c0_61 = arith.constant 0 : index
    %252 = vector.load %arg3[%c7_59, %c0_60, %c0_61] : memref<8x128x128xf32, #tpu.memory_space<vmem>>, vector<1x128x128xf32>
    %253 = vector.shape_cast %252 : vector<1x128x128xf32> to vector<128x128xf32>
    %254 = vector.extract_strided_slice %251 {offsets = [0, 0], sizes = [1, 128], strides = [1, 1]} : vector<10x128xf32> to vector<1x128xf32>
    %255 = vector.extract_strided_slice %251 {offsets = [1, 0], sizes = [1, 128], strides = [1, 1]} : vector<10x128xf32> to vector<1x128xf32>
    %256 = vector.extract_strided_slice %251 {offsets = [2, 0], sizes = [1, 128], strides = [1, 1]} : vector<10x128xf32> to vector<1x128xf32>
    %257 = vector.extract_strided_slice %251 {offsets = [3, 0], sizes = [1, 128], strides = [1, 1]} : vector<10x128xf32> to vector<1x128xf32>
    %258 = vector.extract_strided_slice %251 {offsets = [4, 0], sizes = [1, 128], strides = [1, 1]} : vector<10x128xf32> to vector<1x128xf32>
    %259 = vector.extract_strided_slice %251 {offsets = [5, 0], sizes = [1, 128], strides = [1, 1]} : vector<10x128xf32> to vector<1x128xf32>
    %260 = vector.extract_strided_slice %251 {offsets = [6, 0], sizes = [1, 128], strides = [1, 1]} : vector<10x128xf32> to vector<1x128xf32>
    %261 = vector.extract_strided_slice %251 {offsets = [7, 0], sizes = [1, 128], strides = [1, 1]} : vector<10x128xf32> to vector<1x128xf32>
    %262 = vector.extract_strided_slice %251 {offsets = [8, 0], sizes = [1, 128], strides = [1, 1]} : vector<10x128xf32> to vector<1x128xf32>
    %263 = vector.extract_strided_slice %251 {offsets = [9, 0], sizes = [1, 128], strides = [1, 1]} : vector<10x128xf32> to vector<1x128xf32>
    %264 = arith.addf %247, %255 : vector<1x128xf32>
    %265 = arith.addf %248, %256 : vector<1x128xf32>
    %266 = arith.maximumf %264, %265 : vector<1x128xf32>
    %267 = arith.addf %247, %257 : vector<1x128xf32>
    %268 = arith.addf %248, %258 : vector<1x128xf32>
    %269 = arith.maximumf %267, %268 : vector<1x128xf32>
    %270 = arith.maximumf %269, %249 : vector<1x128xf32>
    %271 = math.exp %266 : vector<1x128xf32>
    %cst_62 = arith.constant dense<0.000000e+00> : vector<1x128xf32>
    %272 = tpu.matmul %271, %253, %cst_62 {dimension_numbers = #tpu.dot_dimension_numbers<[1], [1], [0], [0], [0, 0, 1, 0], [], []>} : vector<1x128xf32>, vector<128x128xf32>, vector<1x128xf32> -> vector<1x128xf32>
    %cst_63 = arith.constant dense<0.000000e+00> : vector<1x128xf32>
    %273 = tpu.matmul %266, %253, %cst_63 {dimension_numbers = #tpu.dot_dimension_numbers<[1], [0], [0], [1], [0, 0, 1, 1], [], []>} : vector<1x128xf32>, vector<128x128xf32>, vector<1x128xf32> -> vector<1x128xf32>
    %274 = vector.broadcast %0 : f32 to vector<1x128xf32>
    %275 = arith.mulf %274, %272 : vector<1x128xf32>
    %276 = arith.subf %242, %275 : vector<1x128xf32>
    %277 = arith.addf %276, %261 : vector<1x128xf32>
    %278 = arith.mulf %273, %259 : vector<1x128xf32>
    %279 = arith.addf %242, %278 : vector<1x128xf32>
    %280 = arith.addf %279, %260 : vector<1x128xf32>
    %281 = arith.addf %247, %254 : vector<1x128xf32>
    %282 = arith.maximumf %280, %281 : vector<1x128xf32>
    %283 = arith.addf %266, %262 : vector<1x128xf32>
    %284 = arith.addf %270, %263 : vector<1x128xf32>
    %285 = arith.maximumf %277, %282 : vector<1x128xf32>
    %286 = arith.maximumf %283, %284 : vector<1x128xf32>
    %287 = arith.maximumf %285, %286 : vector<1x128xf32>
    %288 = vector.shape_cast %287 : vector<1x128xf32> to vector<1x1x128xf32>
    %cst_64 = arith.constant dense<0.000000e+00> : vector<1xf32>
    %289 = vector.multi_reduction <add>, %288, %cst_64 [1, 2] : vector<1x1x128xf32> to vector<1xf32>
    %290 = vector.shape_cast %289 : vector<1xf32> to vector<1x1x1xf32>
    %291 = vector.extract %290[0, 0, 0] : f32 from vector<1x1x1xf32>
    %292 = vector.broadcast %291 : f32 to vector<1x1xf32>
    %cst_65 = arith.constant 1.280000e+02 : f32
    %293 = vector.broadcast %cst_65 : f32 to vector<1x1xf32>
    %294 = arith.divf %292, %293 : vector<1x1xf32>
    %cst_66 = arith.constant 0.000000e+00 : f32
    %295 = vector.broadcast %cst_66 : f32 to vector<1x1xf32>
    %296 = arith.subf %295, %294 : vector<1x1xf32>
    %c0_67 = arith.constant 0 : index
    %c0_68 = arith.constant 0 : index
    %297 = vector.load %arg4[%c0_67, %c0_68] : memref<1x1xf32, #tpu.memory_space<vmem>>, vector<1x1xf32>
    tpu.vector_store %arg4[%c0_67, %c0_68], %296 {strides = array<i32>} : memref<1x1xf32, #tpu.memory_space<vmem>>, vector<1x1xf32>,
    return
  }
}

</mosaic_0001>

<bundles_post_ra>
// kernel: rnn_forward_pallas.1
= control target key start
LH: loop header
LB: loop body
LE: loop exit
PB: predicated region body
PF: predicated region fallthrough
CT: control target
= control target key end

     0   :  { %s1691_s0 = inlined_call_operand.<no memory space> [shape: f32[1], index: 0, kind: input, shape index: {}]   ;;  %s1692_s1 = inlined_call_operand.vmem [shape: f32[4,128], index: 1, kind: input, shape index: {}]   ;;  %s1693_s2 = inlined_call_operand.vmem [shape: f32[8,10,128], index: 2, kind: input, shape index: {}]   ;;  %s1694_s3 = inlined_call_operand.vmem [shape: f32[8,128,128], index: 3, kind: input, shape index: {}]   ;;  %s1695_s4 = inlined_call_operand.hbm [shape: f32[1,1], index: 4, kind: output, shape index: {}]  }
   0x1   :  { %v41_v0 = vld [vmem:[%s1694_s3 + $0x78] sm:$0xff]  ;;  %v40_v1 = vld [vmem:[%s1694_s3 + $0x70] sm:$0xff]  ;;  %v39_v2 = vld [vmem:[%s1694_s3 + $0x68] sm:$0xff] }
   0x2   :  { %80 = vmatpush.msra.mxu1 %v41_v0  ;;  %60 = vmatpush.xpose.msra.mxu0 %v41_v0  ;;  %v38_v3 = vld [vmem:[%s1694_s3 + $0x60] sm:$0xff]  ;;  %v37_v4 = vld [vmem:[%s1694_s3 + $0x58] sm:$0xff]  ;;  %v36_v6 = vld [vmem:[%s1694_s3 + $0x50] sm:$0xff] }
   0x3   :  { %v858_v5 = vld [vmem:[%s1694_s3 + $0xf8] sm:$0xff]  ;;  %v857_v7 = vld [vmem:[%s1694_s3 + $0xf0] sm:$0xff]  ;;  %v35_v8 = vld [vmem:[%s1694_s3 + $0x48] sm:$0xff] }
   0x4   :  { %81 = vmatpush.msra.mxu1 %v40_v1  ;;  %158 = vmatpush.xpose.msra.mxu2 %v858_v5 }
   0x5   :  { %178 = vmatpush.msra.mxu3 %v858_v5 }
   0x6   :  { %82 = vmatpush.msra.mxu1 %v39_v2  ;;  %61 = vmatpush.xpose.msra.mxu0 %v40_v1 }
   0x7   :  { %179 = vmatpush.msra.mxu3 %v857_v7 }
   0x8   :  { %83 = vmatpush.msra.mxu1 %v38_v3 }
   0xa   :  { %84 = vmatpush.msra.mxu1 %v37_v4  ;;  %62 = vmatpush.xpose.msra.mxu0 %v39_v2 }
   0xb   :  { %10 = vsyncpa [#allocation4], 0  ;;  %159 = vmatpush.xpose.msra.mxu2 %v857_v7  ;;  %v856_v9 = vld [vmem:[%s1694_s3 + $0xe8] sm:$0xff]  ;;  %v34_v10 = vld [vmem:[%s1694_s3 + $0x40] sm:$0xff]  ;;  %vm802_vm0 = vcmask 1040384   ;;  %s1016_s11 = smov [#allocation3]  }
   0xc   :  { %85 = vmatpush.msra.mxu1 %v36_v6  ;;  %180 = vmatpush.msra.mxu3 %v856_v9  ;;  %v855_v11 = vld [vmem:[%s1694_s3 + $0xe0] sm:$0xff]  ;;  %v33_v12 = vld [vmem:[%s1694_s3 + $0x38] sm:$0xff]  ;;  %v32_v14 = vld [vmem:[%s1694_s3 + $0x30] sm:$0xff]  ;;  %s830_s12 = sshll.u32 %s1016_s11, 4  ;;  %s832_s15 = sshll.u32 %s1695_s4, 4  ;;  %vm823_vm2 = vcmask 0   ;;  %s831_s12 = int_to_ptr.vmem [resolvable:$true] %s830_s12  ;;  %s833_s15 = int_to_ptr.hbm [resolvable:$true] %s832_s15 }
   0xd   :  { %v854_v13 = vld [vmem:[%s1694_s3 + $0xd8] sm:$0xff]  ;;  %v1090_v15 = vld [vmem:[%s1693_s2] sm:$0xff]  ;;  %v853_v16 = vld [vmem:[%s1694_s3 + $0xd0] sm:$0xff] }
   0xe   :  { %86 = vmatpush.msra.mxu1 %v35_v8  ;;  %63 = vmatpush.xpose.msra.mxu0 %v38_v3  ;;  %v31_v17 = vld [vmem:[%s1694_s3 + $0x28] sm:$0xff]  ;;  %v30_v19 = vld [vmem:[%s1694_s3 + $0x20] sm:$0xff]  ;;  %v43_v20 = vrot.slane %v1090_v15, 1  ;;  %v46_v21 = vrot.slane %v1090_v15, 2  ;;  %v29_v25 = vld [vmem:[%s1694_s3 + $0x18] sm:$0xff]  ;;  %v50_v35 = vrot.slane %v1090_v15, 3 }
   0xf   :  { %181 = vmatpush.msra.mxu3 %v855_v11  ;;  %160 = vmatpush.xpose.msra.mxu2 %v856_v9  ;;  %v852_v18 = vld [vmem:[%s1694_s3 + $0xc8] sm:$0xff]  ;;  %v1109_v22 = vld [vmem:[%s1692_s1 + $0x1] sm:$0x1]  ;;  %v22_v23 = vld [vmem:[%s1692_s1 + $0x2] sm:$0x1]  ;;  %v53_v36 = vrot.slane %v1090_v15, 4 }
  0x10   :  { %87 = vmatpush.msra.mxu1 %v34_v10  ;;  %v851_v24 = vld [vmem:[%s1694_s3 + $0xc0] sm:$0xff]  ;;  %v850_v26 = vld [vmem:[%s1694_s3 + $0xb8] sm:$0xff]  ;;  %v28_v27 = vld [vmem:[%s1694_s3 + $0x10] sm:$0xff]  ;;  %v45_v28 = vadd.f32 %v43_v20, %v1109_v22  ;;  %v48_v29 = vadd.f32 %v46_v21, %v22_v23  ;;  %v52_v37 = vadd.f32 %v50_v35, %v1109_v22  ;;  %v106_v56 = vrot.slane %v1090_v15, 5 }
  0x11   :  { %182 = vmatpush.msra.mxu3 %v854_v13  ;;  %v849_v30 = vld [vmem:[%s1694_s3 + $0xb0] sm:$0xff]  ;;  %v27_v31 = vld [vmem:[%s1694_s3 + $0x8] sm:$0xff]  ;;  %v26_v33 = vld [vmem:[%s1694_s3] sm:$0xff]  ;;  %v55_v38 = vadd.f32 %v53_v36, %v22_v23  ;;  %v110_v63 = vrot.slane %v1090_v15, 6  ;;  %v113_v0 = vadd.f32 %v1090_v15, %v1109_v22 }
  0x12   :  { %88 = vmatpush.msra.mxu1 %v33_v12  ;;  %64 = vmatpush.xpose.msra.mxu0 %v37_v4  ;;  %v848_v32 = vld [vmem:[%s1694_s3 + $0xa8] sm:$0xff]  ;;  %v1139_v34 = vmax.f32 %v45_v28, %v48_v29  ;;  %v847_v39 = vld [vmem:[%s1694_s3 + $0xa0] sm:$0xff]  ;;  %v846_v42 = vld [vmem:[%s1694_s3 + $0x98] sm:$0xff] }
  0x13   :  { %183 = vmatpush.msra.mxu3 %v853_v16  ;;  %161 = vmatpush.xpose.msra.mxu2 %v855_v11  ;;  %v56_v40 = vmax.f32 %v52_v37, %v55_v38  ;;  %v23_v41 = vld [vmem:[%s1692_s1 + $0x3] sm:$0x1]  ;;  %v845_v45 = vld [vmem:[%s1694_s3 + $0x90] sm:$0xff]  ;;  %v25_v46 = vld [vmem:[%s1693_s2 + $0x8] sm:$0x3] }
  0x14   :  { %89 = vmatpush.msra.mxu1 %v32_v14  ;;  %v58_v43 = vmul.f32 1.442695, %v1139_v34  ;;  %v844_v47 = vld [vmem:[%s1694_s3 + $0x88] sm:$0xff]  ;;  %v843_v48 = vld [vmem:[%s1694_s3 + $0x80] sm:$0xff]  ;;  %v117_v49 = vrot.slane %v25_v46, 1  ;;  %v876_v52 = vld [vmem:[%s1694_s3 + $0x178] sm:$0xff]  ;;  %v115_v3 = vadd.f32 %v1139_v34, %v25_v46 }
  0x15   :  { %184 = vmatpush.msra.mxu3 %v852_v18  ;;  %v57_v44 = vmax.f32 %v56_v40, %v23_v41  ;;  %v875_v53 = vld [vmem:[%s1694_s3 + $0x170] sm:$0xff]  ;;  %v874_v54 = vld [vmem:[%s1694_s3 + $0x168] sm:$0xff]  ;;  %v873_v55 = vld [vmem:[%s1694_s3 + $0x160] sm:$0xff] }
  0x16   :  { %90 = vmatpush.msra.mxu1 %v31_v17  ;;  %65 = vmatpush.xpose.msra.mxu0 %v36_v6  ;;  %971 = vpow2.f32 %v58_v43  ;;  %v872_v57 = vld [vmem:[%s1694_s3 + $0x158] sm:$0xff]  ;;  %v1186_v58 = vld [vmem:[%s1692_s1] sm:$0x1]  ;;  %v1191_v60 = vld [vmem:[%s1693_s2 + $0x10] sm:$0xff] }
  0x17   :  { %185 = vmatpush.msra.mxu3 %v851_v24  ;;  %162 = vmatpush.xpose.msra.mxu2 %v854_v13  ;;  %v119_v50 = vadd.f32 %v117_v49, %v57_v44  ;;  %v871_v61 = vld [vmem:[%s1694_s3 + $0x150] sm:$0xff]  ;;  %v870_v1 = vld [vmem:[%s1694_s3 + $0x148] sm:$0xff]  ;;  %v144_v4 = vrot.slane %v1191_v60, 2  ;;  %v151_v5 = vrot.slane %v1191_v60, 4  ;;  %v869_v6 = vld [vmem:[%s1694_s3 + $0x140] sm:$0xff]  ;;  %v141_v9 = vrot.slane %v1191_v60, 1 }
  0x18   :  { %91 = vmatpush.msra.mxu1 %v30_v19  ;;  %v864_v28 = vld [vmem:[%s1694_s3 + $0x118] sm:$0xff]  ;;  %v863_v29 = vld [vmem:[%s1694_s3 + $0x110] sm:$0xff]  ;;  %v892_v37 = vld [vmem:[%s1694_s3 + $0x1e8] sm:$0xff]  ;;  %v203_v41 = vrot.slane %v1191_v60, 5  ;;  %v207_v46 = vrot.slane %v1191_v60, 6 }
  0x19   :  { %186 = vmatpush.msra.mxu3 %v850_v26  ;;  %v153_v13 = vadd.f32 %v151_v5, %v115_v3  ;;  %v893_v36 = vld [vmem:[%s1694_s3 + $0x1f0] sm:$0xff]  ;;  %v891_v40 = vld [vmem:[%s1694_s3 + $0x1e0] sm:$0xff] }
  0x1a   :  { %92 = vmatpush.msra.mxu1 %v29_v25  ;;  %66 = vmatpush.xpose.msra.mxu0 %v35_v8  ;;  %v148_v8 = vrot.slane %v1191_v60, 3 }
  0x1b   :  { %187 = vmatpush.msra.mxu3 %v849_v30  ;;  %163 = vmatpush.xpose.msra.mxu2 %v853_v16  ;;  %v1222_v16 = vld [vmem:[%s1693_s2 + $0x18] sm:$0x3] }
  0x1c   :  { %93 = vmatpush.msra.mxu1 %v28_v27  ;;  %v972_v51 = vpop.eup %971  ;;  %v214_v21 = vrot.slane %v1222_v16, 1 }
  0x1d   :  { %188 = vmatpush.msra.mxu3 %v848_v32 }
  0x1e   :  { %94 = vmatpush.msra.mxu1 %v27_v31  ;;  %67 = vmatpush.xpose.msra.mxu0 %v34_v10  ;;  %v868_v10 = vld [vmem:[%s1694_s3 + $0x138] sm:$0xff] }
  0x1f   :  { %164 = vmatpush.xpose.msra.mxu2 %v852_v18  ;;  %189 = vmatpush.msra.mxu3 %v847_v39 }
  0x20   :  { %95 = vmatpush.msra.mxu1 %v26_v33 }
  0x21   :  { %96 = vmatmul.f32.vlgmr.msra.gmra.mxu1 %v1139_v34  ;;  %190 = vmatpush.msra.mxu3 %v846_v42  ;;  %v894_v34 = vld [vmem:[%s1694_s3 + $0x1f8] sm:$0xff] }
  0x22   :  { %68 = vmatpush.xpose.msra.mxu0 %v33_v12  ;;  %255 = vmatpush.xpose.msrb.mxu1 %v876_v52  ;;  %v146_v12 = vadd.f32 %v144_v4, %v115_v3  ;;  %v884_v3 = vld [vmem:[%s1694_s3 + $0x1a8] sm:$0xff] }
  0x23   :  { %165 = vmatpush.xpose.msra.mxu2 %v851_v24  ;;  %191 = vmatpush.msra.mxu3 %v845_v45 }
  0x25   :  { %192 = vmatpush.msra.mxu3 %v844_v47 }
  0x26   :  { %69 = vmatpush.xpose.msra.mxu0 %v32_v14  ;;  %256 = vmatpush.xpose.msrb.mxu1 %v875_v53  ;;  %v867_v14 = vld [vmem:[%s1694_s3 + $0x130] sm:$0xff] }
  0x27   :  { %166 = vmatpush.xpose.msra.mxu2 %v850_v26  ;;  %193 = vmatpush.msra.mxu3 %v843_v48  ;;  %v866_v26 = vld [vmem:[%s1694_s3 + $0x128] sm:$0xff] }
  0x29   :  { %275 = vmatpush.msrb.mxu3 %v876_v52 }
  0x2a   :  { %70 = vmatpush.xpose.msra.mxu0 %v31_v17  ;;  %257 = vmatpush.xpose.msrb.mxu1 %v874_v54 }
  0x2b   :  { %167 = vmatpush.xpose.msra.mxu2 %v849_v30  ;;  %276 = vmatpush.msrb.mxu3 %v875_v53  ;;  %v862_v30 = vld [vmem:[%s1694_s3 + $0x108] sm:$0xff]  ;;  %v887_v53 = vld [vmem:[%s1694_s3 + $0x1c0] sm:$0xff] }
  0x2d   :  { %277 = vmatpush.msrb.mxu3 %v874_v54 }
  0x2e   :  { %71 = vmatpush.xpose.msra.mxu0 %v30_v19  ;;  %258 = vmatpush.xpose.msrb.mxu1 %v873_v55 }
  0x2f   :  { %168 = vmatpush.xpose.msra.mxu2 %v848_v32  ;;  %278 = vmatpush.msrb.mxu3 %v873_v55 }
  0x31   :  { %279 = vmatpush.msrb.mxu3 %v872_v57 }
  0x32   :  { %72 = vmatpush.xpose.msra.mxu0 %v29_v25  ;;  %259 = vmatpush.xpose.msrb.mxu1 %v872_v57 }
  0x33   :  { %169 = vmatpush.xpose.msra.mxu2 %v847_v39  ;;  %280 = vmatpush.msrb.mxu3 %v871_v61  ;;  %v103_v39 = vrot.slane %v1090_v15, 7  ;;  %v889_v15 = vld [vmem:[%s1694_s3 + $0x1d0] sm:$0xff] }
  0x35   :  { %281 = vmatpush.msrb.mxu3 %v870_v1 }
  0x36   :  { %73 = vmatpush.xpose.msra.mxu0 %v28_v27  ;;  %260 = vmatpush.xpose.msrb.mxu1 %v871_v61  ;;  %v865_v27 = vld [vmem:[%s1694_s3 + $0x120] sm:$0xff]  ;;  %v885_v61 = vld [vmem:[%s1694_s3 + $0x1b0] sm:$0xff] }
  0x37   :  { %170 = vmatpush.xpose.msra.mxu2 %v846_v42  ;;  %282 = vmatpush.msrb.mxu3 %v869_v6  ;;  %v890_v42 = vld [vmem:[%s1694_s3 + $0x1d8] sm:$0xff] }
  0x39   :  { %283 = vmatpush.msrb.mxu3 %v868_v10 }
  0x3a   :  { %74 = vmatpush.xpose.msra.mxu0 %v27_v31  ;;  %261 = vmatpush.xpose.msrb.mxu1 %v870_v1  ;;  %v861_v31 = vld [vmem:[%s1694_s3 + $0x100] sm:$0xff] }
  0x3b   :  { %171 = vmatpush.xpose.msra.mxu2 %v845_v45  ;;  %284 = vmatpush.msrb.mxu3 %v867_v14 }
  0x3d   :  { %285 = vmatpush.msrb.mxu3 %v866_v26 }
  0x3e   :  { %75 = vmatpush.xpose.msra.mxu0 %v26_v33  ;;  %262 = vmatpush.xpose.msrb.mxu1 %v869_v6  ;;  %v1254_v33 = vstv %s1691_s0 }
  0x3f   :  { %172 = vmatpush.xpose.msra.mxu2 %v844_v47  ;;  %286 = vmatpush.msrb.mxu3 %v865_v27  ;;  %v1284_v47 = vld [vmem:[%s1693_s2 + $0x20] sm:$0xff] }
  0x40   :  { %v248_v52 = vrot.slane %v1284_v47, 4  ;;  %v245_v55 = vrot.slane %v1284_v47, 3  ;;  %v238_v57 = vrot.slane %v1284_v47, 1 }
  0x41   :  { %76 = vmatmul.f32.vlgmr.msra.gmra.mxu0 %v972_v51  ;;  %287 = vmatpush.msrb.mxu3 %v864_v28  ;;  %v241_v51 = vrot.slane %v1284_v47, 2 }
  0x42   :  { %263 = vmatpush.xpose.msrb.mxu1 %v868_v10  ;;  %352 = vmatpush.xpose.msrb.mxu0 %v894_v34 }
  0x43   :  { %173 = vmatpush.xpose.msra.mxu2 %v843_v48  ;;  %288 = vmatpush.msrb.mxu3 %v863_v29  ;;  %v888_v48 = vld [vmem:[%s1694_s3 + $0x1c8] sm:$0xff] }
  0x45   :  { %289 = vmatpush.msrb.mxu3 %v862_v30 }
  0x46   :  { %264 = vmatpush.xpose.msrb.mxu1 %v867_v14  ;;  %353 = vmatpush.xpose.msrb.mxu0 %v893_v36  ;;  %v880_v14 = vld [vmem:[%s1694_s3 + $0x188] sm:$0xff] }
  0x47   :  { %290 = vmatpush.msrb.mxu3 %v861_v31  ;;  %372 = vmatpush.msrb.mxu2 %v894_v34 }
  0x49   :  { %373 = vmatpush.msrb.mxu2 %v893_v36 }
  0x4a   :  { %265 = vmatpush.xpose.msrb.mxu1 %v866_v26  ;;  %354 = vmatpush.xpose.msrb.mxu0 %v892_v37  ;;  %v908_v26 = vld [vmem:[%s1694_s3 + $0x258] sm:$0xff] }
  0x4b   :  { %374 = vmatpush.msrb.mxu2 %v892_v37 }
  0x4d   :  { %375 = vmatpush.msrb.mxu2 %v891_v40 }
  0x4e   :  { %266 = vmatpush.xpose.msrb.mxu1 %v865_v27  ;;  %355 = vmatpush.xpose.msrb.mxu0 %v891_v40 }
  0x4f   :  { %376 = vmatpush.msrb.mxu2 %v890_v42 }
  0x51   :  { %377 = vmatpush.msrb.mxu2 %v889_v15 }
  0x52   :  { %267 = vmatpush.xpose.msrb.mxu1 %v864_v28  ;;  %356 = vmatpush.xpose.msrb.mxu0 %v890_v42  ;;  %v907_v28 = vld [vmem:[%s1694_s3 + $0x250] sm:$0xff] }
  0x53   :  { %378 = vmatpush.msrb.mxu2 %v888_v48 }
  0x55   :  { %379 = vmatpush.msrb.mxu2 %v887_v53 }
  0x56   :  { %268 = vmatpush.xpose.msrb.mxu1 %v863_v29  ;;  %357 = vmatpush.xpose.msrb.mxu0 %v889_v15  ;;  %v1395_v15 = vld [vmem:[%s1693_s2 + $0x38] sm:$0x3] }
  0x5a   :  { %269 = vmatpush.xpose.msrb.mxu1 %v862_v30  ;;  %358 = vmatpush.xpose.msrb.mxu0 %v888_v48 }
  0x5e   :  { %270 = vmatpush.xpose.msrb.mxu1 %v861_v31  ;;  %359 = vmatpush.xpose.msrb.mxu0 %v887_v53  ;;  %v304_v31 = vrot.slane %v1284_v47, 6 }
  0x9e   :  { %v97_v59 = vpop.f32.mrf.mxu1 }
  0x9f   :  { %v108_v62 = vmul.f32 %v106_v56, %v97_v59 }
  0xa1   :  { %v109_v2 = vadd.f32 %v108_v62, %v1186_v58  ;;  %v1312_v62 = vld [vmem:[%s1693_s2 + $0x28] sm:$0x3] }
  0xa2   :  { %v311_v6 = vrot.slane %v1312_v62, 1 }
  0xa3   :  { %v112_v7 = vadd.f32 %v110_v63, %v109_v2 }
  0xa5   :  { %v1214_v11 = vmax.f32 %v112_v7, %v113_v0 }
  0xa7   :  { %v150_v17 = vadd.f32 %v148_v8, %v1214_v11  ;;  %v143_v18 = vadd.f32 %v141_v9, %v1214_v11 }
  0xa9   :  { %v1226_v19 = vmax.f32 %v143_v18, %v146_v12  ;;  %v154_v20 = vmax.f32 %v150_v17, %v153_v13  ;;  %v882_v12 = vld [vmem:[%s1694_s3 + $0x198] sm:$0xff]  ;;  %v881_v13 = vld [vmem:[%s1694_s3 + $0x190] sm:$0xff] }
  0xaa   :  { %v912_v18 = vld [vmem:[%s1694_s3 + $0x278] sm:$0xff] }
  0xab   :  { %194 = vmatmul.f32.vlgmr.msra.gmra.mxu3 %v1226_v19  ;;  %v156_v22 = vmul.f32 1.442695, %v1226_v19  ;;  %v155_v23 = vmax.f32 %v154_v20, %v119_v50  ;;  %v210_v50 = vadd.f32 %v1191_v60, %v1214_v11  ;;  %v212_v56 = vadd.f32 %v1222_v16, %v1226_v19  ;;  %v883_v11 = vld [vmem:[%s1694_s3 + $0x1a0] sm:$0xff]  ;;  %469 = vmatpush.msra.mxu1 %v912_v18  ;;  %v911_v19 = vld [vmem:[%s1694_s3 + $0x270] sm:$0xff] }
  0xac   :  { %v879_v16 = vld [vmem:[%s1694_s3 + $0x180] sm:$0xff]  ;;  %449 = vmatpush.xpose.msra.mxu3 %v912_v18 }
  0xad   :  { %973 = vpow2.f32 %v156_v22  ;;  %v1231_v24 = vadd.f32 %v214_v21, %v155_v23  ;;  %v243_v1 = vadd.f32 %v241_v51, %v212_v56  ;;  %v250_v2 = vadd.f32 %v248_v52, %v212_v56  ;;  %470 = vmatpush.msra.mxu1 %v911_v19  ;;  %v910_v21 = vld [vmem:[%s1694_s3 + $0x268] sm:$0xff]  ;;  %v909_v22 = vld [vmem:[%s1694_s3 + $0x260] sm:$0xff] }
  0xae   :  { %v902_v51 = vld [vmem:[%s1694_s3 + $0x228] sm:$0xff] }
  0xaf   :  { %471 = vmatpush.msra.mxu1 %v910_v21 }
  0xb0   :  { %450 = vmatpush.xpose.msra.mxu3 %v911_v19 }
  0xb1   :  { %472 = vmatpush.msra.mxu1 %v909_v22 }
  0xb3   :  { %v974_v25 = vpop.eup %973  ;;  %473 = vmatpush.msra.mxu1 %v908_v26 }
  0xb4   :  { %174 = vmatmul.f32.vlgmr.msra.gmra.mxu2 %v974_v25  ;;  %v300_v25 = vrot.slane %v1284_v47, 5  ;;  %451 = vmatpush.xpose.msra.mxu3 %v910_v21 }
  0xb5   :  { %474 = vmatpush.msra.mxu1 %v907_v28 }
  0xb8   :  { %452 = vmatpush.xpose.msra.mxu3 %v909_v22  ;;  %v923_v22 = vld [vmem:[%s1694_s3 + $0x2c0] sm:$0xff] }
  0xbc   :  { %453 = vmatpush.xpose.msra.mxu3 %v908_v26 }
  0xbe   :  { %v77_v32 = vpop.f32.mrf.mxu0 }
  0xbf   :  { %v101_v35 = vmul.f32 %v1254_v33, %v77_v32  ;;  %v906_v32 = vld [vmem:[%s1694_s3 + $0x248] sm:$0xff] }
  0xc0   :  { %475 = vmatpush.msra.mxu1 %v906_v32  ;;  %454 = vmatpush.xpose.msra.mxu3 %v907_v28 }
  0xc1   :  { %v102_v38 = vsub.f32 %v1186_v58, %v101_v35  ;;  %v886_v58 = vld [vmem:[%s1694_s3 + $0x1b8] sm:$0xff] }
  0xc2   :  { %380 = vmatpush.msrb.mxu2 %v886_v58  ;;  %360 = vmatpush.xpose.msrb.mxu0 %v886_v58 }
  0xc3   :  { %v1275_v43 = vadd.f32 %v103_v39, %v102_v38  ;;  %v905_v38 = vld [vmem:[%s1694_s3 + $0x240] sm:$0xff] }
  0xc4   :  { %381 = vmatpush.msrb.mxu2 %v885_v61  ;;  %476 = vmatpush.msra.mxu1 %v905_v38 }
  0xc5   :  { %455 = vmatpush.xpose.msra.mxu3 %v906_v32 }
  0xc6   :  { %382 = vmatpush.msrb.mxu2 %v884_v3  ;;  %361 = vmatpush.xpose.msrb.mxu0 %v885_v61  ;;  %v900_v61 = vld [vmem:[%s1694_s3 + $0x218] sm:$0xff] }
  0xc8   :  { %383 = vmatpush.msrb.mxu2 %v883_v11 }
  0xc9   :  { %456 = vmatpush.xpose.msra.mxu3 %v905_v38 }
  0xca   :  { %362 = vmatpush.xpose.msrb.mxu0 %v884_v3  ;;  %384 = vmatpush.msrb.mxu2 %v882_v12  ;;  %v929_v3 = vld [vmem:[%s1694_s3 + $0x2f0] sm:$0xff] }
  0xcc   :  { %385 = vmatpush.msrb.mxu2 %v881_v13 }
  0xce   :  { %363 = vmatpush.xpose.msrb.mxu0 %v883_v11  ;;  %386 = vmatpush.msrb.mxu2 %v880_v14 }
  0xd0   :  { %387 = vmatpush.msrb.mxu2 %v879_v16 }
  0xd2   :  { %364 = vmatpush.xpose.msrb.mxu0 %v882_v12  ;;  %v925_v12 = vld [vmem:[%s1694_s3 + $0x2d0] sm:$0xff] }
  0xd6   :  { %365 = vmatpush.xpose.msrb.mxu0 %v881_v13  ;;  %v1453_v13 = vld [vmem:[%s1693_s2 + $0x40] sm:$0xff] }
  0xd7   :  { %v442_v19 = vrot.slane %v1453_v13, 4  ;;  %v435_v21 = vrot.slane %v1453_v13, 2  ;;  %v432_v26 = vrot.slane %v1453_v13, 1 }
  0xda   :  { %366 = vmatpush.xpose.msrb.mxu0 %v880_v14 }
  0xde   :  { %367 = vmatpush.xpose.msrb.mxu0 %v879_v16 }
 0x12e   :  { %v195_v44 = vpop.f32.mrf.mxu3 }
 0x12f   :  { %v205_v45 = vmul.f32 %v203_v41, %v195_v44 }
 0x131   :  { %v206_v49 = vadd.f32 %v205_v45, %v1275_v43  ;;  %v903_v45 = vld [vmem:[%s1694_s3 + $0x230] sm:$0xff] }
 0x133   :  { %v209_v54 = vadd.f32 %v207_v46, %v206_v49 }
 0x135   :  { %v1304_v59 = vmax.f32 %v209_v54, %v210_v50  ;;  %v408_v54 = vrot.slane %v1395_v15, 1 }
 0x137   :  { %v247_v63 = vadd.f32 %v245_v55, %v1304_v59  ;;  %v240_v0 = vadd.f32 %v238_v57, %v1304_v59  ;;  %v175_v17 = vpop.f32.mrf.mxu2  ;;  %v307_v35 = vadd.f32 %v1284_v47, %v1304_v59  ;;  %v901_v59 = vld [vmem:[%s1694_s3 + $0x220] sm:$0xff] }
 0x138   :  { %v198_v20 = vmul.f32 %v175_v17, %v1254_v33  ;;  %v924_v17 = vld [vmem:[%s1694_s3 + $0x2c8] sm:$0xff] }
 0x139   :  { %v1319_v4 = vmax.f32 %v240_v0, %v243_v1  ;;  %v251_v5 = vmax.f32 %v247_v63, %v250_v2  ;;  %v898_v63 = vld [vmem:[%s1694_s3 + $0x208] sm:$0xff]  ;;  %v897_v0 = vld [vmem:[%s1694_s3 + $0x200] sm:$0xff]  ;;  %v930_v2 = vld [vmem:[%s1694_s3 + $0x2f8] sm:$0xff] }
 0x13a   :  { %v199_v23 = vsub.f32 %v1275_v43, %v198_v20  ;;  %v904_v43 = vld [vmem:[%s1694_s3 + $0x238] sm:$0xff]  ;;  %546 = vmatpush.xpose.msra.mxu2 %v930_v2 }
 0x13b   :  { %v253_v7 = vmul.f32 1.442695, %v1319_v4  ;;  %291 = vmatmul.f32.vlgmr.msrb.gmra.mxu3 %v1319_v4  ;;  %v252_v8 = vmax.f32 %v251_v5, %v1231_v24  ;;  %v200_v24 = vrot.slane %v1191_v60, 7  ;;  %v1370_v60 = vld [vmem:[%s1693_s2 + $0x30] sm:$0xff]  ;;  %v309_v41 = vadd.f32 %v1312_v62, %v1319_v4  ;;  %477 = vmatpush.msra.mxu1 %v904_v43  ;;  %v928_v5 = vld [vmem:[%s1694_s3 + $0x2e8] sm:$0xff] }
 0x13c   :  { %v338_v36 = vrot.slane %v1370_v60, 2  ;;  %v345_v37 = vrot.slane %v1370_v60, 4  ;;  %v342_v40 = vrot.slane %v1370_v60, 3  ;;  %v335_v42 = vrot.slane %v1370_v60, 1  ;;  %457 = vmatpush.xpose.msra.mxu3 %v904_v43  ;;  %v899_v62 = vld [vmem:[%s1694_s3 + $0x210] sm:$0xff] }
 0x13d   :  { %975 = vpow2.f32 %v253_v7  ;;  %v1325_v9 = vadd.f32 %v311_v6, %v252_v8  ;;  %v1364_v29 = vadd.f32 %v200_v24, %v199_v23  ;;  %478 = vmatpush.msra.mxu1 %v903_v45  ;;  %v927_v6 = vld [vmem:[%s1694_s3 + $0x2e0] sm:$0xff]  ;;  %v297_v8 = vrot.slane %v1284_v47, 7 }
 0x13e   :  { %v340_v49 = vadd.f32 %v338_v36, %v309_v41  ;;  %v347_v50 = vadd.f32 %v345_v37, %v309_v41  ;;  %547 = vmatpush.xpose.msra.mxu2 %v929_v3  ;;  %v401_v16 = vrot.slane %v1370_v60, 6  ;;  %v920_v36 = vld [vmem:[%s1694_s3 + $0x2a8] sm:$0xff] }
 0x13f   :  { %479 = vmatpush.msra.mxu1 %v902_v51 }
 0x140   :  { %458 = vmatpush.xpose.msra.mxu3 %v903_v45  ;;  %v917_v45 = vld [vmem:[%s1694_s3 + $0x290] sm:$0xff] }
 0x141   :  { %480 = vmatpush.msra.mxu1 %v901_v59 }
 0x142   :  { %548 = vmatpush.xpose.msra.mxu2 %v928_v5 }
 0x143   :  { %v976_v10 = vpop.eup %975  ;;  %481 = vmatpush.msra.mxu1 %v900_v61 }
 0x144   :  { %271 = vmatmul.f32.vlgmr.msrb.gmra.mxu1 %v976_v10  ;;  %459 = vmatpush.xpose.msra.mxu3 %v902_v51  ;;  %v926_v10 = vld [vmem:[%s1694_s3 + $0x2d8] sm:$0xff]  ;;  %v947_v51 = vld [vmem:[%s1694_s3 + $0x370] sm:$0xff] }
 0x145   :  { %482 = vmatpush.msra.mxu1 %v899_v62 }
 0x146   :  { %549 = vmatpush.xpose.msra.mxu2 %v927_v6 }
 0x147   :  { %483 = vmatpush.msra.mxu1 %v898_v63 }
 0x148   :  { %460 = vmatpush.xpose.msra.mxu3 %v901_v59 }
 0x149   :  { %484 = vmatpush.msra.mxu1 %v897_v0 }
 0x14a   :  { %550 = vmatpush.xpose.msra.mxu2 %v926_v10 }
 0x14c   :  { %461 = vmatpush.xpose.msra.mxu3 %v900_v61  ;;  %v943_v61 = vld [vmem:[%s1694_s3 + $0x350] sm:$0xff] }
 0x14e   :  { %551 = vmatpush.xpose.msra.mxu2 %v925_v12 }
 0x150   :  { %462 = vmatpush.xpose.msra.mxu3 %v899_v62 }
 0x152   :  { %552 = vmatpush.xpose.msra.mxu2 %v924_v17 }
 0x154   :  { %463 = vmatpush.xpose.msra.mxu3 %v898_v63 }
 0x156   :  { %553 = vmatpush.xpose.msra.mxu2 %v923_v22 }
 0x158   :  { %464 = vmatpush.xpose.msra.mxu3 %v897_v0  ;;  %v498_v0 = vrot.slane %v1453_v13, 6 }
 0x15c   :  { %566 = vmatpush.msrb.mxu3 %v930_v2 }
 0x15e   :  { %567 = vmatpush.msrb.mxu3 %v929_v3 }
 0x160   :  { %568 = vmatpush.msrb.mxu3 %v928_v5 }
 0x162   :  { %569 = vmatpush.msrb.mxu3 %v927_v6  ;;  %v941_v6 = vld [vmem:[%s1694_s3 + $0x340] sm:$0xff] }
 0x164   :  { %570 = vmatpush.msrb.mxu3 %v926_v10 }
 0x166   :  { %571 = vmatpush.msrb.mxu3 %v925_v12 }
 0x168   :  { %572 = vmatpush.msrb.mxu3 %v924_v17 }
 0x16a   :  { %573 = vmatpush.msrb.mxu3 %v923_v22 }
 0x1be   :  { %v292_v27 = vpop.f32.mrf.mxu3 }
 0x1bf   :  { %v302_v30 = vmul.f32 %v300_v25, %v292_v27  ;;  %v439_v25 = vrot.slane %v1453_v13, 3  ;;  %v922_v27 = vld [vmem:[%s1694_s3 + $0x2b8] sm:$0xff] }
 0x1c0   :  { %574 = vmatpush.msrb.mxu3 %v922_v27  ;;  %554 = vmatpush.xpose.msra.mxu2 %v922_v27 }
 0x1c1   :  { %v303_v34 = vadd.f32 %v302_v30, %v1364_v29  ;;  %v272_v1 = vpop.f32.mrf.mxu1  ;;  %v1484_v30 = vld [vmem:[%s1693_s2 + $0x48] sm:$0x3] }
 0x1c2   :  { %v295_v4 = vmul.f32 %v272_v1, %v1254_v33  ;;  %v942_v1 = vld [vmem:[%s1694_s3 + $0x348] sm:$0xff] }
 0x1c3   :  { %v306_v39 = vadd.f32 %v304_v31, %v303_v34 }
 0x1c4   :  { %v296_v7 = vsub.f32 %v1364_v29, %v295_v4  ;;  %v921_v29 = vld [vmem:[%s1694_s3 + $0x2b0] sm:$0xff] }
 0x1c5   :  { %v1390_v44 = vmax.f32 %v306_v39, %v307_v35  ;;  %575 = vmatpush.msrb.mxu3 %v921_v29  ;;  %v505_v39 = vrot.slane %v1484_v30, 1  ;;  %555 = vmatpush.xpose.msra.mxu2 %v921_v29  ;;  %v936_v29 = vld [vmem:[%s1694_s3 + $0x318] sm:$0xff] }
 0x1c6   :  { %v1455_v47 = vadd.f32 %v297_v8, %v296_v7 }
 0x1c7   :  { %v344_v46 = vadd.f32 %v342_v40, %v1390_v44  ;;  %v337_v48 = vadd.f32 %v335_v42, %v1390_v44  ;;  %v404_v20 = vadd.f32 %v1370_v60, %v1390_v44  ;;  %576 = vmatpush.msrb.mxu3 %v920_v36  ;;  %v919_v44 = vld [vmem:[%s1694_s3 + $0x2a0] sm:$0xff] }
 0x1c9   :  { %v1405_v52 = vmax.f32 %v337_v48, %v340_v49  ;;  %v348_v53 = vmax.f32 %v344_v46, %v347_v50  ;;  %556 = vmatpush.xpose.msra.mxu2 %v920_v36  ;;  %577 = vmatpush.msrb.mxu3 %v919_v44  ;;  %v916_v46 = vld [vmem:[%s1694_s3 + $0x288] sm:$0xff]  ;;  %v915_v48 = vld [vmem:[%s1694_s3 + $0x280] sm:$0xff]  ;;  %v948_v50 = vld [vmem:[%s1694_s3 + $0x378] sm:$0xff] }
 0x1ca   :  { %643 = vmatpush.xpose.msrb.mxu1 %v948_v50  ;;  %v965_v36 = vld [vmem:[%s1694_s3 + $0x3f0] sm:$0xff] }
 0x1cb   :  { %v349_v55 = vmax.f32 %v348_v53, %v1325_v9  ;;  %v350_v56 = vmul.f32 1.442695, %v1405_v52  ;;  %388 = vmatmul.f32.vlgmr.msrb.gmra.mxu2 %v1405_v52  ;;  %v397_v9 = vrot.slane %v1370_v60, 5  ;;  %v406_v23 = vadd.f32 %v1395_v15, %v1405_v52  ;;  %v918_v15 = vld [vmem:[%s1694_s3 + $0x298] sm:$0xff]  ;;  %v946_v53 = vld [vmem:[%s1694_s3 + $0x368] sm:$0xff] }
 0x1cc   :  { %578 = vmatpush.msrb.mxu3 %v918_v15 }
 0x1cd   :  { %977 = vpow2.f32 %v350_v56  ;;  %v1411_v57 = vadd.f32 %v408_v54, %v349_v55  ;;  %v444_v31 = vadd.f32 %v442_v19, %v406_v23  ;;  %v437_v35 = vadd.f32 %v435_v21, %v406_v23  ;;  %557 = vmatpush.xpose.msra.mxu2 %v919_v44  ;;  %v945_v54 = vld [vmem:[%s1694_s3 + $0x360] sm:$0xff] }
 0x1ce   :  { %579 = vmatpush.msrb.mxu3 %v917_v45  ;;  %644 = vmatpush.xpose.msrb.mxu1 %v947_v51  ;;  %v394_v56 = vrot.slane %v1370_v60, 7  ;;  %v1542_v60 = vld [vmem:[%s1693_s2 + $0x50] sm:$0xff] }
 0x1cf   :  { %v532_v4 = vrot.slane %v1542_v60, 2  ;;  %v539_v5 = vrot.slane %v1542_v60, 4  ;;  %v536_v8 = vrot.slane %v1542_v60, 3  ;;  %v529_v10 = vrot.slane %v1542_v60, 1 }
 0x1d0   :  { %580 = vmatpush.msrb.mxu3 %v916_v46 }
 0x1d1   :  { %558 = vmatpush.xpose.msra.mxu2 %v918_v15  ;;  %v961_v15 = vld [vmem:[%s1694_s3 + $0x3d0] sm:$0xff] }
 0x1d2   :  { %581 = vmatpush.msrb.mxu3 %v915_v48  ;;  %645 = vmatpush.xpose.msrb.mxu1 %v946_v53 }
 0x1d3   :  { %v978_v58 = vpop.eup %977 }
 0x1d4   :  { %368 = vmatmul.f32.vlgmr.msrb.gmra.mxu0 %v978_v58  ;;  %v944_v58 = vld [vmem:[%s1694_s3 + $0x358] sm:$0xff] }
 0x1d5   :  { %559 = vmatpush.xpose.msra.mxu2 %v917_v45 }
 0x1d6   :  { %646 = vmatpush.xpose.msrb.mxu1 %v945_v54 }
 0x1d9   :  { %560 = vmatpush.xpose.msra.mxu2 %v916_v46 }
 0x1da   :  { %647 = vmatpush.xpose.msrb.mxu1 %v944_v58 }
 0x1dd   :  { %561 = vmatpush.xpose.msra.mxu2 %v915_v48  ;;  %v595_v48 = vrot.slane %v1542_v60, 6 }
 0x1de   :  { %648 = vmatpush.xpose.msrb.mxu1 %v943_v61 }
 0x1e2   :  { %649 = vmatpush.xpose.msrb.mxu1 %v942_v1 }
 0x1e6   :  { %650 = vmatpush.xpose.msrb.mxu1 %v941_v6 }
 0x24e   :  { %v389_v11 = vpop.f32.mrf.mxu2 }
 0x24f   :  { %v399_v14 = vmul.f32 %v397_v9, %v389_v11  ;;  %v940_v11 = vld [vmem:[%s1694_s3 + $0x338] sm:$0xff] }
 0x250   :  { %651 = vmatpush.xpose.msrb.mxu1 %v940_v11 }
 0x251   :  { %v400_v18 = vadd.f32 %v399_v14, %v1455_v47  ;;  %v369_v49 = vpop.f32.mrf.mxu0  ;;  %v1570_v14 = vld [vmem:[%s1693_s2 + $0x58] sm:$0x3] }
 0x252   :  { %v392_v52 = vmul.f32 %v369_v49, %v1254_v33  ;;  %v602_v23 = vrot.slane %v1570_v14, 1  ;;  %v960_v49 = vld [vmem:[%s1694_s3 + $0x3c8] sm:$0xff] }
 0x253   :  { %v403_v24 = vadd.f32 %v401_v16, %v400_v18 }
 0x254   :  { %v393_v55 = vsub.f32 %v1455_v47, %v392_v52  ;;  %v939_v47 = vld [vmem:[%s1694_s3 + $0x330] sm:$0xff] }
 0x255   :  { %v1476_v28 = vmax.f32 %v403_v24, %v404_v20  ;;  %v938_v20 = vld [vmem:[%s1694_s3 + $0x328] sm:$0xff]  ;;  %652 = vmatpush.xpose.msrb.mxu1 %v939_v47 }
 0x256   :  { %v1536_v62 = vadd.f32 %v394_v56, %v393_v55 }
 0x257   :  { %v441_v32 = vadd.f32 %v439_v25, %v1476_v28  ;;  %v434_v34 = vadd.f32 %v432_v26, %v1476_v28  ;;  %v501_v3 = vadd.f32 %v1453_v13, %v1476_v28  ;;  %v937_v28 = vld [vmem:[%s1694_s3 + $0x320] sm:$0xff] }
 0x259   :  { %v445_v37 = vmax.f32 %v441_v32, %v444_v31  ;;  %v1491_v38 = vmax.f32 %v434_v34, %v437_v35  ;;  %653 = vmatpush.xpose.msrb.mxu1 %v938_v20  ;;  %v934_v31 = vld [vmem:[%s1694_s3 + $0x308] sm:$0xff]  ;;  %v933_v32 = vld [vmem:[%s1694_s3 + $0x300] sm:$0xff]  ;;  %v966_v35 = vld [vmem:[%s1694_s3 + $0x3f8] sm:$0xff] }
 0x25a   :  { %740 = vmatpush.xpose.msra.mxu0 %v966_v35  ;;  %760 = vmatpush.msrb.mxu2 %v966_v35 }
 0x25b   :  { %v446_v40 = vmax.f32 %v445_v37, %v1411_v57  ;;  %v447_v41 = vmul.f32 1.442695, %v1491_v38  ;;  %485 = vmatmul.f32.vlgmr.msra.gmra.mxu1 %v1491_v38  ;;  %v494_v57 = vrot.slane %v1453_v13, 5  ;;  %v503_v9 = vadd.f32 %v1484_v30, %v1491_v38  ;;  %v935_v30 = vld [vmem:[%s1694_s3 + $0x310] sm:$0xff]  ;;  %v964_v38 = vld [vmem:[%s1694_s3 + $0x3e8] sm:$0xff] }
 0x25c   :  { %761 = vmatpush.msrb.mxu2 %v965_v36 }
 0x25d   :  { %979 = vpow2.f32 %v447_v41  ;;  %v1497_v42 = vadd.f32 %v505_v39, %v446_v40  ;;  %v534_v18 = vadd.f32 %v532_v4, %v503_v9  ;;  %v541_v19 = vadd.f32 %v539_v5, %v503_v9  ;;  %654 = vmatpush.xpose.msrb.mxu1 %v937_v28  ;;  %v963_v39 = vld [vmem:[%s1694_s3 + $0x3e0] sm:$0xff]  ;;  %v956_v4 = vld [vmem:[%s1694_s3 + $0x3a8] sm:$0xff] }
 0x25e   :  { %741 = vmatpush.xpose.msra.mxu0 %v965_v36  ;;  %762 = vmatpush.msrb.mxu2 %v964_v38  ;;  %v491_v41 = vrot.slane %v1453_v13, 7  ;;  %v1628_v13 = vld [vmem:[%s1693_s2 + $0x60] sm:$0xff] }
 0x25f   :  { %v629_v52 = vrot.slane %v1628_v13, 2  ;;  %v633_v56 = vrot.slane %v1628_v13, 3 }
 0x260   :  { %763 = vmatpush.msrb.mxu2 %v963_v39 }
 0x261   :  { %655 = vmatpush.xpose.msrb.mxu1 %v936_v29 }
 0x262   :  { %742 = vmatpush.xpose.msra.mxu0 %v964_v38 }
 0x263   :  { %v980_v43 = vpop.eup %979 }
 0x264   :  { %465 = vmatmul.f32.vlgmr.msra.gmra.mxu3 %v980_v43  ;;  %v962_v43 = vld [vmem:[%s1694_s3 + $0x3d8] sm:$0xff] }
 0x265   :  { %663 = vmatpush.msra.mxu3 %v948_v50  ;;  %656 = vmatpush.xpose.msrb.mxu1 %v935_v30 }
 0x266   :  { %764 = vmatpush.msrb.mxu2 %v962_v43  ;;  %743 = vmatpush.xpose.msra.mxu0 %v963_v39 }
 0x267   :  { %664 = vmatpush.msra.mxu3 %v947_v51 }
 0x268   :  { %765 = vmatpush.msrb.mxu2 %v961_v15 }
 0x269   :  { %665 = vmatpush.msra.mxu3 %v946_v53  ;;  %657 = vmatpush.xpose.msrb.mxu1 %v934_v31  ;;  %v636_v53 = vrot.slane %v1628_v13, 4 }
 0x26a   :  { %766 = vmatpush.msrb.mxu2 %v960_v49  ;;  %744 = vmatpush.xpose.msra.mxu0 %v962_v43 }
 0x26b   :  { %666 = vmatpush.msra.mxu3 %v945_v54  ;;  %v959_v54 = vld [vmem:[%s1694_s3 + $0x3c0] sm:$0xff] }
 0x26c   :  { %767 = vmatpush.msrb.mxu2 %v959_v54 }
 0x26d   :  { %667 = vmatpush.msra.mxu3 %v944_v58  ;;  %658 = vmatpush.xpose.msrb.mxu1 %v933_v32  ;;  %v626_v58 = vrot.slane %v1628_v13, 1 }
 0x26e   :  { %745 = vmatpush.xpose.msra.mxu0 %v961_v15 }
 0x26f   :  { %668 = vmatpush.msra.mxu3 %v943_v61 }
 0x271   :  { %669 = vmatpush.msra.mxu3 %v942_v1 }
 0x272   :  { %746 = vmatpush.xpose.msra.mxu0 %v960_v49 }
 0x273   :  { %670 = vmatpush.msra.mxu3 %v941_v6 }
 0x275   :  { %671 = vmatpush.msra.mxu3 %v940_v11 }
 0x276   :  { %747 = vmatpush.xpose.msra.mxu0 %v959_v54  ;;  %v685_v54 = vrot.slane %v1628_v13, 7 }
 0x277   :  { %672 = vmatpush.msra.mxu3 %v939_v47  ;;  %v954_v47 = vld [vmem:[%s1694_s3 + $0x398] sm:$0xff] }
 0x279   :  { %673 = vmatpush.msra.mxu3 %v938_v20 }
 0x27b   :  { %674 = vmatpush.msra.mxu3 %v937_v28 }
 0x27d   :  { %675 = vmatpush.msra.mxu3 %v936_v29 }
 0x27f   :  { %676 = vmatpush.msra.mxu3 %v935_v30 }
 0x281   :  { %677 = vmatpush.msra.mxu3 %v934_v31 }
 0x283   :  { %678 = vmatpush.msra.mxu3 %v933_v32 }
 0x2d8   :  { %v486_v59 = vpop.f32.mrf.mxu1 }
 0x2d9   :  { %v496_v63 = vmul.f32 %v494_v57, %v486_v59  ;;  %v958_v59 = vld [vmem:[%s1694_s3 + $0x3b8] sm:$0xff] }
 0x2da   :  { %768 = vmatpush.msrb.mxu2 %v958_v59  ;;  %748 = vmatpush.xpose.msra.mxu0 %v958_v59 }
 0x2db   :  { %v497_v2 = vadd.f32 %v496_v63, %v1536_v62  ;;  %v932_v63 = vld [vmem:[%s1693_s2 + $0x68] sm:$0x3] }
 0x2dd   :  { %v500_v7 = vadd.f32 %v498_v0, %v497_v2 }
 0x2df   :  { %v1562_v12 = vmax.f32 %v500_v7, %v501_v3  ;;  %v699_v7 = vrot.slane %v932_v63, 1 }
 0x2e1   :  { %v538_v16 = vadd.f32 %v536_v8, %v1562_v12  ;;  %v531_v17 = vadd.f32 %v529_v10, %v1562_v12  ;;  %v598_v51 = vadd.f32 %v1542_v60, %v1562_v12  ;;  %v955_v12 = vld [vmem:[%s1694_s3 + $0x3a0] sm:$0xff] }
 0x2e3   :  { %v1577_v21 = vmax.f32 %v531_v17, %v534_v18  ;;  %v542_v22 = vmax.f32 %v538_v16, %v541_v19  ;;  %v952_v16 = vld [vmem:[%s1694_s3 + $0x388] sm:$0xff]  ;;  %v951_v17 = vld [vmem:[%s1694_s3 + $0x380] sm:$0xff] }
 0x2e5   :  { %v544_v24 = vmul.f32 1.442695, %v1577_v21  ;;  %582 = vmatmul.f32.vlgmr.msrb.gmra.mxu3 %v1577_v21  ;;  %v543_v25 = vmax.f32 %v542_v22, %v1497_v42  ;;  %v591_v42 = vrot.slane %v1542_v60, 5  ;;  %v600_v57 = vadd.f32 %v1570_v14, %v1577_v21  ;;  %v953_v14 = vld [vmem:[%s1694_s3 + $0x390] sm:$0xff] }
 0x2e6   :  { %v588_v21 = vrot.slane %v1542_v60, 7  ;;  %v688_v22 = vrot.slane %v1628_v13, 5 }
 0x2e7   :  { %981 = vpow2.f32 %v544_v24  ;;  %v1583_v26 = vadd.f32 %v602_v23, %v543_v25  ;;  %v466_v34 = vpop.f32.mrf.mxu3  ;;  %v631_v2 = vadd.f32 %v629_v52, %v600_v57  ;;  %v638_v3 = vadd.f32 %v636_v53, %v600_v57 }
 0x2e8   :  { %v489_v37 = vmul.f32 %v466_v34, %v1254_v33 }
 0x2ea   :  { %v490_v40 = vsub.f32 %v1536_v62, %v489_v37  ;;  %v957_v62 = vld [vmem:[%s1694_s3 + $0x3b0] sm:$0xff]  ;;  %v950_v37 = vld [vmem:[%s1693_s2 + $0x78] sm:$0x3] }
 0x2eb   :  { %769 = vmatpush.msrb.mxu2 %v957_v62  ;;  %749 = vmatpush.xpose.msra.mxu0 %v957_v62 }
 0x2ec   :  { %v1622_v45 = vadd.f32 %v491_v41, %v490_v40 }
 0x2ed   :  { %v982_v27 = vpop.eup %981  ;;  %770 = vmatpush.msrb.mxu2 %v956_v4 }
 0x2ee   :  { %562 = vmatmul.f32.vlgmr.msra.gmra.mxu2 %v982_v27  ;;  %v949_v27 = vld [vmem:[%s1693_s2 + $0x70] sm:$0xff] }
 0x2ef   :  { %750 = vmatpush.xpose.msra.mxu0 %v956_v4  ;;  %771 = vmatpush.msrb.mxu2 %v955_v12  ;;  %v726_v30 = vrot.slane %v949_v27, 2  ;;  %v733_v31 = vrot.slane %v949_v27, 4  ;;  %v730_v34 = vrot.slane %v949_v27, 3  ;;  %v723_v60 = vrot.slane %v949_v27, 1 }
 0x2f0   :  { %v789_v59 = vrot.slane %v949_v27, 6 }
 0x2f1   :  { %772 = vmatpush.msrb.mxu2 %v954_v47 }
 0x2f3   :  { %751 = vmatpush.xpose.msra.mxu0 %v955_v12  ;;  %773 = vmatpush.msrb.mxu2 %v953_v14 }
 0x2f5   :  { %774 = vmatpush.msrb.mxu2 %v952_v16 }
 0x2f7   :  { %752 = vmatpush.xpose.msra.mxu0 %v954_v47  ;;  %775 = vmatpush.msrb.mxu2 %v951_v17 }
 0x2fb   :  { %753 = vmatpush.xpose.msra.mxu0 %v953_v14 }
 0x2ff   :  { %754 = vmatpush.xpose.msra.mxu0 %v952_v16 }
 0x303   :  { %755 = vmatpush.xpose.msra.mxu0 %v951_v17 }
 0x368   :  { %v583_v44 = vpop.f32.mrf.mxu3 }
 0x369   :  { %v593_v46 = vmul.f32 %v591_v42, %v583_v44  ;;  %v796_v44 = vrot.slane %v950_v37, 1 }
 0x36b   :  { %v594_v50 = vadd.f32 %v593_v46, %v1622_v45 }
 0x36d   :  { %v597_v55 = vadd.f32 %v595_v48, %v594_v50 }
 0x36f   :  { %v599_v61 = vmax.f32 %v597_v55, %v598_v51  ;;  %v785_v55 = vrot.slane %v949_v27, 5 }
 0x371   :  { %v635_v0 = vadd.f32 %v633_v56, %v599_v61  ;;  %v628_v1 = vadd.f32 %v626_v58, %v599_v61  ;;  %v563_v18 = vpop.f32.mrf.mxu2  ;;  %v695_v29 = vadd.f32 %v1628_v13, %v599_v61 }
 0x372   :  { %v586_v19 = vmul.f32 %v563_v18, %v1254_v33 }
 0x373   :  { %v632_v5 = vmax.f32 %v628_v1, %v631_v2  ;;  %v639_v6 = vmax.f32 %v635_v0, %v638_v3  ;;  %v782_v0 = vrot.slane %v949_v27, 7 }
 0x374   :  { %v587_v20 = vsub.f32 %v1622_v45, %v586_v19 }
 0x375   :  { %v641_v8 = vmul.f32 1.442695, %v632_v5  ;;  %679 = vmatmul.f32.vlgmr.msra.gmra.mxu3 %v632_v5  ;;  %v640_v9 = vmax.f32 %v639_v6, %v1583_v26  ;;  %v692_v26 = vrot.slane %v1628_v13, 6  ;;  %v697_v35 = vadd.f32 %v932_v63, %v632_v5 }
 0x376   :  { %v590_v24 = vadd.f32 %v588_v21, %v587_v20 }
 0x377   :  { %983 = vpow2.f32 %v641_v8  ;;  %v701_v10 = vadd.f32 %v699_v7, %v640_v9  ;;  %v728_v40 = vadd.f32 %v726_v30, %v697_v35  ;;  %v735_v41 = vadd.f32 %v733_v31, %v697_v35 }
 0x37d   :  { %v984_v11 = vpop.eup %983 }
 0x37e   :  { %659 = vmatmul.f32.vlgmr.msrb.gmra.mxu1 %v984_v11 }
 0x3f8   :  { %v680_v23 = vpop.f32.mrf.mxu3 }
 0x3f9   :  { %v690_v25 = vmul.f32 %v688_v22, %v680_v23 }
 0x3fb   :  { %v691_v28 = vadd.f32 %v690_v25, %v590_v24  ;;  %v660_v51 = vpop.f32.mrf.mxu1 }
 0x3fc   :  { %v683_v52 = vmul.f32 %v660_v51, %v1254_v33 }
 0x3fd   :  { %v694_v32 = vadd.f32 %v692_v26, %v691_v28 }
 0x3fe   :  { %v684_v53 = vsub.f32 %v590_v24, %v683_v52 }
 0x3ff   :  { %v696_v36 = vmax.f32 %v694_v32, %v695_v29 }
 0x400   :  { %v687_v57 = vadd.f32 %v685_v54, %v684_v53 }
 0x401   :  { %v732_v38 = vadd.f32 %v730_v34, %v696_v36  ;;  %v725_v39 = vadd.f32 %v723_v60, %v696_v36  ;;  %v792_v2 = vadd.f32 %v949_v27, %v696_v36 }
 0x403   :  { %v729_v42 = vmax.f32 %v725_v39, %v728_v40  ;;  %v736_v43 = vmax.f32 %v732_v38, %v735_v41 }
 0x405   :  { %v738_v15 = vmul.f32 1.442695, %v729_v42  ;;  %776 = vmatmul.f32.vlgmr.msrb.gmra.mxu2 %v729_v42  ;;  %v737_v45 = vmax.f32 %v736_v43, %v701_v10  ;;  %v794_v46 = vadd.f32 %v950_v37, %v729_v42 }
 0x407   :  { %985 = vpow2.f32 %v738_v15  ;;  %v798_v48 = vadd.f32 %v796_v44, %v737_v45 }
 0x409   :  { %v800_v49 = vmax.f32 %v794_v46, %v798_v48 }
 0x40d   :  { %v986_v50 = vpop.eup %985 }
 0x40e   :  { %756 = vmatmul.f32.vlgmr.msra.gmra.mxu0 %v986_v50 }
 0x488   :  { %v777_v56 = vpop.f32.mrf.mxu2 }
 0x489   :  { %v787_v58 = vmul.f32 %v785_v55, %v777_v56 }
 0x48b   :  { %v788_v61 = vadd.f32 %v787_v58, %v687_v57  ;;  %v757_v62 = vpop.f32.mrf.mxu0 }
 0x48c   :  { %v780_v63 = vmul.f32 %v757_v62, %v1254_v33  ;;  %v1015_v33 = vmov 128.0  }
 0x48d   :  { %v791_v1 = vadd.f32 %v789_v59, %v788_v61  ;;  %987 = vrcp.f32 %v1015_v33 }
 0x48e   :  { %v781_v3 = vsub.f32 %v687_v57, %v780_v63 }
 0x48f   :  { %v793_v4 = vmax.f32 %v791_v1, %v792_v2 }
 0x490   :  { %v784_v5 = vadd.f32 %v782_v0, %v781_v3 }
 0x492   :  { %v799_v6 = vmax.f32 %v784_v5, %v793_v4 }
 0x493   :  { %v988_v16 = vpop.eup %987 }
 0x494   :  { %v801_v7 = vmax.f32 %v799_v6, %v800_v49  ;;  %v815_v17 = vmul.f32 128.0, %v988_v16  ;;  %vm819_vm1 = vweird.f32 %v988_v16 }
 0x496   :  { %v803_v8 = vsel %vm802_vm0, %v801_v7, 0.0  ;;  %v816_v18 = vsub.f32 1.0, %v815_v17 }
 0x497   :  { %804 = vadd.xlane.f32.xlu0 %v803_v8 }
 0x498   :  { %v817_v19 = vmul.f32 %v988_v16, %v816_v18 }
 0x49a   :  { %v818_v20 = vadd.f32 %v988_v16, %v817_v19 }
 0x49c   :  { %v820_v21 = vsel %vm819_vm1, %v988_v16, %v818_v20 }
 0x50a   :  { %v805_v13 = vpop.xlane.xlu0 %804 }
 0x50b   :  { %v806_v9 = vrot.slane %v805_v13, 4 }
 0x50d   :  { %v807_v10 = vadd.f32 %v806_v9, %v805_v13 }
 0x50f   :  { %v808_v11 = vrot.slane %v807_v10, 2 }
 0x511   :  { %v809_v12 = vadd.f32 %v808_v11, %v807_v10 }
 0x513   :  { %v810_v47 = vrot.slane %v809_v12, 1 }
 0x515   :  { %v811_v14 = vadd.f32 %v810_v47, %v809_v12 }
 0x517   :  { %967 = vpush %v811_v14 }
 0x548   :  { %s968_s2 = spop %967 }
 0x549   :  { %v813_v22 = vstv %s968_s2 }
 0x54a   :  { %v821_v23 = vmul.f32 %v820_v21, %v813_v22 }
 0x54c   :  { %v822_v24 = vsub.f32 0.0, %v821_v23 }
 0x54e   :  { %824 = vst.msk [vmem:[#allocation3] sm:$0x1] %vm823_vm2, %v822_v24 }
 0x54f   :  { %835 = dma.vmem_to_hbm [thread:$0]  %s831_s12, 16, %s833_s15, [#allocation4]  }
 0x550   :  { %1013 = dma.done.wait [#allocation4], 16  }
 0x551   :  { %1014 = vsyncadd [#allocation4], 4294967280 }
 0x552   :  { %840 = vsyncpa [#allocation4], 1 }

</bundles_post_ra>
